<compile_context>
chip_gen: v5e
topology: v5e:2x2
jax: 0.10.0
libtpu: 0.0.40
codegen_flags: <defaults>
</compile_context>

<pallas_src>
from functools import partial

import jax
import jax.numpy as jnp
from jax.experimental import pallas as pl
from jax.experimental.pallas import tpu as pltpu

LANE = 128


# ----------------------------- Pallas kernel ------------------------------- #

def _fused_chunk_kernel(dims,
                        a_ref, x_ref, w1_ref, w2_ref, w3_ref,
                        wenc_ref, wdec_ref, bdec_ref,
                        w4_ref, w5_ref, w6_ref, bias_ref,
                        o_ref, h3_nm, h4_nm, h4_gm):
    """Forward for one chunk of G graphs (all tensors VMEM resident)."""
    G, N, emb, latent = dims
    a = a_ref[0]                                     # (G*N, G*N) bf16 block-diag

    def gcn(h, w_ref_, bias_row, width, relu):
        # out = A_hat @ (h @ W) + b   (bf16 MXU inputs, f32 accumulation)
        xw = jnp.dot(h.astype(jnp.bfloat16), w_ref_[...],
                     preferred_element_type=jnp.float32)
        out = jnp.dot(a, xw.astype(jnp.bfloat16),
                      preferred_element_type=jnp.float32)
        out = out + bias_ref[bias_row:bias_row + 1, :width]
        return jnp.maximum(out, 0.0) if relu else out

    # --- GCN stack 1 (per-chunk block-diagonal aggregation) ---
    h = gcn(x_ref[...], w1_ref, 0, emb[0], True)     # conv1 + ReLU
    h = gcn(h, w2_ref, 1, emb[1], True)              # conv2 + ReLU
    h3 = gcn(h, w3_ref, 2, emb[2], False)            # conv3, (G*N, E2) f32

    # graph-major -> node-major scratch (contiguous row-block stores only)
    for g in range(G):
        h3_nm[g] = h3[g * N:(g + 1) * N, :].astype(jnp.bfloat16)

    # --- flatten -> Encoder, batched over the G graphs of the chunk ---
    # z[g] = enc_b + sum_n h3[g, n, :] @ Wenc[n]
    z = jnp.zeros((G, latent), jnp.float32) + bias_ref[3:4, :latent]
    for n in range(N):                   # num_nodes is a small static constant
        z = z + jnp.dot(h3_nm[:, n, :], wenc_ref[n],
                        preferred_element_type=jnp.float32)
    # TODO(synk): Encoder assumed to be a single nn.Linear (no activation).

    # --- Decoder + ReLU (self.act), batched over graphs ---
    # h4[g, n, :] = relu(z[g] @ Wdec[n] + dec_b[n])
    zb = z.astype(jnp.bfloat16)
    for n in range(N):
        dn = jnp.dot(zb, wdec_ref[n], preferred_element_type=jnp.float32)
        dn = dn + bdec_ref[n:n + 1, :]
        h4_nm[n] = jnp.maximum(dn, 0.0).astype(jnp.bfloat16)

    # node-major -> graph-major for GCN stack 2
    for g in range(G):
        h4_gm[g * N:(g + 1) * N, :] = h4_nm[:, g, :]

    # --- GCN stack 2 ---
    h = gcn(h4_gm[...], w4_ref, 4, emb[4], True)     # conv4 + ReLU
    h = gcn(h, w5_ref, 5, emb[5], True)              # conv5 + ReLU
    out = gcn(h, w6_ref, 6, LANE, False)             # conv6, lane-padded to 128
    o_ref[...] = out.astype(o_ref.dtype)             # single lane-dense store


def _const_spec(shape):
    """Full-array block, same block for every grid step (fetched once)."""
    nd = len(shape)
    return pl.BlockSpec(shape, lambda c, _nd=nd: (0,) * _nd)


# ------------------------------ JAX glue ----------------------------------- #

def build_a_hat_chunks(edge_index, batch_size, num_nodes, graphs_per_chunk):
    """Per-chunk block-diagonal symmetric-normalized adjacency with self loops.

    Assumes PyG-style batching: node g*num_nodes + n belongs to graph g and
    edges never cross graphs.  Returns (num_chunks, G*N, G*N) f32.
    """
    src, dst = edge_index[0], edge_index[1]
    g_id = dst // num_nodes
    a = jnp.zeros((batch_size, num_nodes, num_nodes), jnp.float32)
    a = a.at[g_id, dst % num_nodes, src % num_nodes].set(1.0)      # A[dst, src]=1
    a = a + jnp.eye(num_nodes, dtype=jnp.float32)[None]            # self loops
    deg = a.sum(axis=2)
    d_inv_sqrt = jnp.where(deg > 0, 1.0 / jnp.sqrt(deg), 0.0)
    a = a * d_inv_sqrt[:, :, None] * d_inv_sqrt[:, None, :]

    G = graphs_per_chunk
    num_chunks = batch_size // G
    GN = G * num_nodes
    a_r = a.reshape(num_chunks, G, num_nodes, num_nodes)
    blocks = jnp.zeros((num_chunks, GN, GN), jnp.float32)
    for g in range(G):
        sl = slice(g * num_nodes, (g + 1) * num_nodes)
        blocks = blocks.at[:, sl, sl].set(a_r[:, g])
    return blocks


def _glorot(key, shape):
    fan_in, fan_out = shape
    lim = jnp.sqrt(6.0 / (fan_in + fan_out))
    return jax.random.uniform(key, shape, jnp.float32, -lim, lim)


def init_params(key, num_nodes, num_features, emb, latent_dim):
    layer_dims = [
        ("w1", "b1", num_features, emb[0]),
        ("w2", "b2", emb[0], emb[1]),
        ("w3", "b3", emb[1], emb[2]),
        ("enc_w", "enc_b", num_nodes * emb[2], latent_dim),
        ("dec_w", "dec_b", latent_dim, num_nodes * emb[3]),
        ("w4", "b4", emb[3], emb[4]),
        ("w5", "b5", emb[4], emb[5]),
        ("w6", "b6", emb[5], 1),
    ]
    keys = jax.random.split(key, len(layer_dims))
    params = {}
    for k, (wn, bn, fi, fo) in zip(keys, layer_dims):
        params[wn] = _glorot(k, (fi, fo))
        params[bn] = jnp.zeros((fo,), jnp.float32)
    return params


def model3_variant4_forward(params, x, edge_index, *, batch_size, num_nodes,
                            emb, latent, graphs_per_chunk=None):
    f32, bf16 = jnp.float32, jnp.bfloat16
    N, F = num_nodes, x.shape[1]
    E2, E3 = emb[2], emb[3]
    n_total = batch_size * N

    # Static guards: bias pack / lane padding silently truncate wider layers.
    assert max([F, latent] + list(emb)) <= LANE, \
        "all feature widths and latent dim must be <= 128 (one lane tile)"

    # Pick graphs-per-chunk: target >=128 matmul rows, must divide batch_size.
    if graphs_per_chunk is None:
        graphs_per_chunk = max(1, min(batch_size, max(1, 128 // N)))
        while batch_size % graphs_per_chunk:
            graphs_per_chunk -= 1
    G = graphs_per_chunk
    assert batch_size % G == 0, "graphs_per_chunk must divide batch_size"
    GN = G * N
    num_chunks = batch_size // G
    assert GN % 8 == 0 or num_chunks == 1, "chunk rows must be sublane aligned"

    # Host-side one-time re-layouts (bf16 for MXU operands, f32 for VPU adds).
    a_blocks = build_a_hat_chunks(edge_index, batch_size, N, G).astype(bf16)
    x_bf = x.astype(bf16)
    wenc_r = params["enc_w"].reshape(N, E2, latent).astype(bf16)      # (N,E2,L)
    wdec_r = params["dec_w"].reshape(latent, N, E3).transpose(1, 0, 2).astype(bf16)
    bdec_r = params["dec_b"].reshape(N, E3).astype(f32)               # (N,E3)
    w6p = jnp.zeros((emb[5], LANE), f32).at[:, 0].set(params["w6"][:, 0]).astype(bf16)

    bias_pack = jnp.zeros((8, LANE), f32)
    bias_pack = bias_pack.at[0, :emb[0]].set(params["b1"])
    bias_pack = bias_pack.at[1, :emb[1]].set(params["b2"])
    bias_pack = bias_pack.at[2, :emb[2]].set(params["b3"])
    bias_pack = bias_pack.at[3, :latent].set(params["enc_b"])
    bias_pack = bias_pack.at[4, :emb[4]].set(params["b4"])
    bias_pack = bias_pack.at[5, :emb[5]].set(params["b5"])
    bias_pack = bias_pack.at[6, 0].set(params["b6"][0])

    operands = (a_blocks, x_bf,
                params["w1"].astype(bf16), params["w2"].astype(bf16),
                params["w3"].astype(bf16),
                wenc_r, wdec_r, bdec_r,
                params["w4"].astype(bf16), params["w5"].astype(bf16),
                w6p, bias_pack)

    in_specs = [
        pl.BlockSpec((1, GN, GN), lambda c: (c, 0, 0)),   # per-chunk A_hat block
        pl.BlockSpec((GN, F), lambda c: (c, 0)),          # per-chunk node features
    ] + [_const_spec(op.shape) for op in operands[2:]]    # weights: resident

    out_specs = pl.BlockSpec((GN, LANE), lambda c: (c, 0))
    scratch_shapes = [pltpu.VMEM((G, N, E2), bf16),       # h3 node-major
                      pltpu.VMEM((N, G, E3), bf16),       # h4 node-major
                      pltpu.VMEM((GN, E3), bf16)]         # h4 graph-major

    # Rough advisory cost estimate.
    def mm(m, k, n):
        return 2 * m * k * n
    flops = 0
    gcn_dims = [(F, emb[0]), (emb[0], emb[1]), (emb[1], emb[2]),
                (emb[3], emb[4]), (emb[4], emb[5]), (emb[5], LANE)]
    for fi, fo in gcn_dims:
        flops += num_chunks * (mm(GN, fi, fo) + mm(GN, GN, fo))
    flops += num_chunks * (mm(G, N * E2, latent) + mm(G, latent, N * E3))
    operand_bytes = sum(int(op.size) * op.dtype.itemsize for op in operands)
    out_bytes = n_total * LANE * 4
    bytes_accessed = operand_bytes + out_bytes

    # Explicit VMEM limit sized from the working set (generous headroom).
    scratch_bytes = (G * N * E2 + N * G * E3 + GN * E3) * 2
    out_block_bytes = GN * LANE * 4
    vmem_limit = int(min(max(2 * (operand_bytes + out_block_bytes)
                             + scratch_bytes + (4 << 20), 4 << 20), 64 << 20))

    out_full = pl.pallas_call(
        partial(_fused_chunk_kernel, (G, N, tuple(emb), latent)),
        out_shape=jax.ShapeDtypeStruct((n_total, LANE), f32),
        grid=(num_chunks,),
        in_specs=in_specs,
        out_specs=out_specs,
        scratch_shapes=scratch_shapes,
        compiler_params=pltpu.CompilerParams(
            dimension_semantics=("parallel",),
            vmem_limit_bytes=vmem_limit),
        cost_estimate=pl.CostEstimate(flops=int(flops), transcendentals=0,
                                      bytes_accessed=int(bytes_accessed)),
    )(*operands)

    # Lane-dense (n_total, 128) slab -> keep column 0 -> view(-1, num_nodes).
    return out_full[:, 0].reshape(batch_size, num_nodes)


# ------------------------------- main --------------------------------------- #

if __name__ == "__main__":
    num_nodes = 8
    num_features = 4
    embedding_sequence = [16, 16, 8, 8, 16, 16]
    latent_space_dim = 32
    batch_size = 4
    graphs_per_chunk = 2          # -> grid=(2,) so chunked path is exercised
    n_total = batch_size * num_nodes

    key = jax.random.PRNGKey(0)
    k_x, k_p = jax.random.split(key)

    # node features for the whole batch
    x = jax.random.normal(k_x, (n_total, num_features), jnp.float32)

    # deterministic graph: a bidirectional ring inside each graph of the batch
    src_list, dst_list = [], []
    for b in range(batch_size):
        off = b * num_nodes
        for i in range(num_nodes):
            j = (i + 1) % num_nodes
            src_list += [off + i, off + j]
            dst_list += [off + j, off + i]
    edge_index = jnp.array([src_list, dst_list], dtype=jnp.int32)

    params = init_params(k_p, num_nodes, num_features,
                         embedding_sequence, latent_space_dim)

    out = model3_variant4_forward(params, x, edge_index,
                                  batch_size=batch_size,
                                  num_nodes=num_nodes,
                                  emb=embedding_sequence,
                                  latent=latent_space_dim,
                                  graphs_per_chunk=graphs_per_chunk)
    out = jax.block_until_ready(out)

    assert out.shape == (batch_size, num_nodes), out.shape
    assert out.dtype == jnp.float32
    print("KERNEL_OK")
</pallas_src>

<mosaic_0001>
module attributes {stable_mosaic.version = 11 : i64} {
  func.func @_fused_chunk_kernel(%arg0: i32, %arg1: memref<1x16x16xbf16, #tpu.memory_space<vmem>>, %arg2: memref<16x4xbf16, #tpu.memory_space<vmem>>, %arg3: memref<4x16xbf16, #tpu.memory_space<vmem>>, %arg4: memref<16x16xbf16, #tpu.memory_space<vmem>>, %arg5: memref<16x8xbf16, #tpu.memory_space<vmem>>, %arg6: memref<8x8x32xbf16, #tpu.memory_space<vmem>>, %arg7: memref<8x32x8xbf16, #tpu.memory_space<vmem>>, %arg8: memref<8x8xf32, #tpu.memory_space<vmem>>, %arg9: memref<8x16xbf16, #tpu.memory_space<vmem>>, %arg10: memref<16x16xbf16, #tpu.memory_space<vmem>>, %arg11: memref<16x128xbf16, #tpu.memory_space<vmem>>, %arg12: memref<8x128xf32, #tpu.memory_space<vmem>>, %arg13: memref<16x128xf32, #tpu.memory_space<vmem>>, %arg14: memref<2x8x8xbf16, #tpu.memory_space<vmem>>, %arg15: memref<8x2x8xbf16, #tpu.memory_space<vmem>>, %arg16: memref<16x8xbf16, #tpu.memory_space<vmem>>) attributes {dimension_semantics = [#tpu.dimension_semantics<parallel>], iteration_bounds = array<i64: 2>, scalar_prefetch = 0 : i64, scratch_operands = 3 : i64, tpu.core_type = #tpu.core_type<tc>, window_params = [{transform_indices = @transform_0, window_bounds = array<i64: 1, 16, 16>}, {transform_indices = @transform_1, window_bounds = array<i64: 16, 4>}, {pipeline_mode = #tpu.pipeline_mode<synchronous>, transform_indices = @transform_2, window_bounds = array<i64: 4, 16>}, {pipeline_mode = #tpu.pipeline_mode<synchronous>, transform_indices = @transform_3, window_bounds = array<i64: 16, 16>}, {pipeline_mode = #tpu.pipeline_mode<synchronous>, transform_indices = @transform_4, window_bounds = array<i64: 16, 8>}, {pipeline_mode = #tpu.pipeline_mode<synchronous>, transform_indices = @transform_5, window_bounds = array<i64: 8, 8, 32>}, {pipeline_mode = #tpu.pipeline_mode<synchronous>, transform_indices = @transform_6, window_bounds = array<i64: 8, 32, 8>}, {pipeline_mode = #tpu.pipeline_mode<synchronous>, transform_indices = @transform_7, window_bounds = array<i64: 8, 8>}, {pipeline_mode = #tpu.pipeline_mode<synchronous>, transform_indices = @transform_8, window_bounds = array<i64: 8, 16>}, {pipeline_mode = #tpu.pipeline_mode<synchronous>, transform_indices = @transform_9, window_bounds = array<i64: 16, 16>}, {pipeline_mode = #tpu.pipeline_mode<synchronous>, transform_indices = @transform_10, window_bounds = array<i64: 16, 128>}, {pipeline_mode = #tpu.pipeline_mode<synchronous>, transform_indices = @transform_11, window_bounds = array<i64: 8, 128>}, {transform_indices = @transform_12, window_bounds = array<i64: 16, 128>}]} {
    %c0 = arith.constant 0 : index
    %c0_0 = arith.constant 0 : index
    %c0_1 = arith.constant 0 : index
    %0 = vector.load %arg1[%c0, %c0_0, %c0_1] : memref<1x16x16xbf16, #tpu.memory_space<vmem>>, vector<1x16x16xbf16>
    %1 = vector.shape_cast %0 : vector<1x16x16xbf16> to vector<16x16xbf16>
    %c0_2 = arith.constant 0 : index
    %c0_3 = arith.constant 0 : index
    %2 = vector.load %arg2[%c0_2, %c0_3] : memref<16x4xbf16, #tpu.memory_space<vmem>>, vector<16x4xbf16>
    %c0_4 = arith.constant 0 : index
    %c0_5 = arith.constant 0 : index
    %3 = vector.load %arg3[%c0_4, %c0_5] : memref<4x16xbf16, #tpu.memory_space<vmem>>, vector<4x16xbf16>
    %cst = arith.constant dense<0.000000e+00> : vector<16x16xf32>
    %4 = tpu.matmul %2, %3, %cst {dimension_numbers = #tpu.dot_dimension_numbers<[1], [0], [0], [1], [0, 0, 1, 1], [], []>} : vector<16x4xbf16>, vector<4x16xbf16>, vector<16x16xf32> -> vector<16x16xf32>
    %5 = arith.truncf %4 : vector<16x16xf32> to vector<16x16xbf16>
    %cst_6 = arith.constant dense<0.000000e+00> : vector<16x16xf32>
    %6 = tpu.matmul %1, %5, %cst_6 {dimension_numbers = #tpu.dot_dimension_numbers<[1], [0], [0], [1], [0, 0, 1, 1], [], []>} : vector<16x16xbf16>, vector<16x16xbf16>, vector<16x16xf32> -> vector<16x16xf32>
    %c0_7 = arith.constant 0 : index
    %c0_8 = arith.constant 0 : index
    %7 = vector.load %arg12[%c0_7, %c0_8] : memref<8x128xf32, #tpu.memory_space<vmem>>, vector<1x16xf32>
    %8 = vector.broadcast %7 : vector<1x16xf32> to vector<16x16xf32>
    %9 = arith.addf %6, %8 : vector<16x16xf32>
    %cst_9 = arith.constant 0.000000e+00 : f32
    %10 = vector.broadcast %cst_9 : f32 to vector<16x16xf32>
    %11 = arith.maximumf %9, %10 : vector<16x16xf32>
    %12 = arith.truncf %11 : vector<16x16xf32> to vector<16x16xbf16>
    %c0_10 = arith.constant 0 : index
    %c0_11 = arith.constant 0 : index
    %13 = vector.load %arg4[%c0_10, %c0_11] : memref<16x16xbf16, #tpu.memory_space<vmem>>, vector<16x16xbf16>
    %cst_12 = arith.constant dense<0.000000e+00> : vector<16x16xf32>
    %14 = tpu.matmul %12, %13, %cst_12 {dimension_numbers = #tpu.dot_dimension_numbers<[1], [0], [0], [1], [0, 0, 1, 1], [], []>} : vector<16x16xbf16>, vector<16x16xbf16>, vector<16x16xf32> -> vector<16x16xf32>
    %15 = arith.truncf %14 : vector<16x16xf32> to vector<16x16xbf16>
    %cst_13 = arith.constant dense<0.000000e+00> : vector<16x16xf32>
    %16 = tpu.matmul %1, %15, %cst_13 {dimension_numbers = #tpu.dot_dimension_numbers<[1], [0], [0], [1], [0, 0, 1, 1], [], []>} : vector<16x16xbf16>, vector<16x16xbf16>, vector<16x16xf32> -> vector<16x16xf32>
    %c1 = arith.constant 1 : index
    %c0_14 = arith.constant 0 : index
    %17 = vector.load %arg12[%c1, %c0_14] : memref<8x128xf32, #tpu.memory_space<vmem>>, vector<1x16xf32>
    %18 = vector.broadcast %17 : vector<1x16xf32> to vector<16x16xf32>
    %19 = arith.addf %16, %18 : vector<16x16xf32>
    %cst_15 = arith.constant 0.000000e+00 : f32
    %20 = vector.broadcast %cst_15 : f32 to vector<16x16xf32>
    %21 = arith.maximumf %19, %20 : vector<16x16xf32>
    %22 = arith.truncf %21 : vector<16x16xf32> to vector<16x16xbf16>
    %c0_16 = arith.constant 0 : index
    %c0_17 = arith.constant 0 : index
    %23 = vector.load %arg5[%c0_16, %c0_17] : memref<16x8xbf16, #tpu.memory_space<vmem>>, vector<16x8xbf16>
    %cst_18 = arith.constant dense<0.000000e+00> : vector<16x8xf32>
    %24 = tpu.matmul %22, %23, %cst_18 {dimension_numbers = #tpu.dot_dimension_numbers<[1], [0], [0], [1], [0, 0, 1, 1], [], []>} : vector<16x16xbf16>, vector<16x8xbf16>, vector<16x8xf32> -> vector<16x8xf32>
    %25 = arith.truncf %24 : vector<16x8xf32> to vector<16x8xbf16>
    %cst_19 = arith.constant dense<0.000000e+00> : vector<16x8xf32>
    %26 = tpu.matmul %1, %25, %cst_19 {dimension_numbers = #tpu.dot_dimension_numbers<[1], [0], [0], [1], [0, 0, 1, 1], [], []>} : vector<16x16xbf16>, vector<16x8xbf16>, vector<16x8xf32> -> vector<16x8xf32>
    %c2 = arith.constant 2 : index
    %c0_20 = arith.constant 0 : index
    %27 = vector.load %arg12[%c2, %c0_20] : memref<8x128xf32, #tpu.memory_space<vmem>>, vector<1x8xf32>
    %28 = vector.broadcast %27 : vector<1x8xf32> to vector<16x8xf32>
    %29 = arith.addf %26, %28 : vector<16x8xf32>
    %30 = vector.extract_strided_slice %29 {offsets = [0, 0], sizes = [8, 8], strides = [1, 1]} : vector<16x8xf32> to vector<8x8xf32>
    %31 = arith.truncf %30 : vector<8x8xf32> to vector<8x8xbf16>
    %c0_21 = arith.constant 0 : index
    %c0_22 = arith.constant 0 : index
    %c0_23 = arith.constant 0 : index
    %32 = vector.load %arg14[%c0_21, %c0_22, %c0_23] : memref<2x8x8xbf16, #tpu.memory_space<vmem>>, vector<1x8x8xbf16>
    %33 = vector.shape_cast %32 : vector<1x8x8xbf16> to vector<8x8xbf16>
    %34 = vector.shape_cast %31 : vector<8x8xbf16> to vector<1x8x8xbf16>
    tpu.vector_store %arg14[%c0_21, %c0_22, %c0_23], %34 {strides = array<i32>} : memref<2x8x8xbf16, #tpu.memory_space<vmem>>, vector<1x8x8xbf16>,
    %35 = vector.extract_strided_slice %29 {offsets = [8, 0], sizes = [8, 8], strides = [1, 1]} : vector<16x8xf32> to vector<8x8xf32>
    %36 = arith.truncf %35 : vector<8x8xf32> to vector<8x8xbf16>
    %c1_24 = arith.constant 1 : index
    %c0_25 = arith.constant 0 : index
    %c0_26 = arith.constant 0 : index
    %37 = vector.load %arg14[%c1_24, %c0_25, %c0_26] : memref<2x8x8xbf16, #tpu.memory_space<vmem>>, vector<1x8x8xbf16>
    %38 = vector.shape_cast %37 : vector<1x8x8xbf16> to vector<8x8xbf16>
    %39 = vector.shape_cast %36 : vector<8x8xbf16> to vector<1x8x8xbf16>
    tpu.vector_store %arg14[%c1_24, %c0_25, %c0_26], %39 {strides = array<i32>} : memref<2x8x8xbf16, #tpu.memory_space<vmem>>, vector<1x8x8xbf16>,
    %cst_27 = arith.constant 0.000000e+00 : f32
    %40 = vector.broadcast %cst_27 : f32 to vector<2x32xf32>
    %c3 = arith.constant 3 : index
    %c0_28 = arith.constant 0 : index
    %41 = vector.load %arg12[%c3, %c0_28] : memref<8x128xf32, #tpu.memory_space<vmem>>, vector<1x32xf32>
    %42 = vector.broadcast %41 : vector<1x32xf32> to vector<2x32xf32>
    %43 = arith.addf %40, %42 : vector<2x32xf32>
    %c0_29 = arith.constant 0 : index
    %c0_30 = arith.constant 0 : index
    %c0_31 = arith.constant 0 : index
    %44 = vector.load %arg14[%c0_29, %c0_30, %c0_31] : memref<2x8x8xbf16, #tpu.memory_space<vmem>>, vector<2x1x8xbf16>
    %45 = vector.shape_cast %44 : vector<2x1x8xbf16> to vector<2x8xbf16>
    %c0_32 = arith.constant 0 : index
    %c0_33 = arith.constant 0 : index
    %c0_34 = arith.constant 0 : index
    %46 = vector.load %arg6[%c0_32, %c0_33, %c0_34] : memref<8x8x32xbf16, #tpu.memory_space<vmem>>, vector<1x8x32xbf16>
    %47 = vector.shape_cast %46 : vector<1x8x32xbf16> to vector<8x32xbf16>
    %cst_35 = arith.constant dense<0.000000e+00> : vector<2x32xf32>
    %48 = tpu.matmul %45, %47, %cst_35 {dimension_numbers = #tpu.dot_dimension_numbers<[1], [0], [0], [1], [0, 0, 1, 1], [], []>} : vector<2x8xbf16>, vector<8x32xbf16>, vector<2x32xf32> -> vector<2x32xf32>
    %49 = arith.addf %43, %48 : vector<2x32xf32>
    %c0_36 = arith.constant 0 : index
    %c1_37 = arith.constant 1 : index
    %c0_38 = arith.constant 0 : index
    %50 = vector.load %arg14[%c0_36, %c1_37, %c0_38] : memref<2x8x8xbf16, #tpu.memory_space<vmem>>, vector<2x1x8xbf16>
    %51 = vector.shape_cast %50 : vector<2x1x8xbf16> to vector<2x8xbf16>
    %c1_39 = arith.constant 1 : index
    %c0_40 = arith.constant 0 : index
    %c0_41 = arith.constant 0 : index
    %52 = vector.load %arg6[%c1_39, %c0_40, %c0_41] : memref<8x8x32xbf16, #tpu.memory_space<vmem>>, vector<1x8x32xbf16>
    %53 = vector.shape_cast %52 : vector<1x8x32xbf16> to vector<8x32xbf16>
    %cst_42 = arith.constant dense<0.000000e+00> : vector<2x32xf32>
    %54 = tpu.matmul %51, %53, %cst_42 {dimension_numbers = #tpu.dot_dimension_numbers<[1], [0], [0], [1], [0, 0, 1, 1], [], []>} : vector<2x8xbf16>, vector<8x32xbf16>, vector<2x32xf32> -> vector<2x32xf32>
    %55 = arith.addf %49, %54 : vector<2x32xf32>
    %c0_43 = arith.constant 0 : index
    %c2_44 = arith.constant 2 : index
    %c0_45 = arith.constant 0 : index
    %56 = vector.load %arg14[%c0_43, %c2_44, %c0_45] : memref<2x8x8xbf16, #tpu.memory_space<vmem>>, vector<2x1x8xbf16>
    %57 = vector.shape_cast %56 : vector<2x1x8xbf16> to vector<2x8xbf16>
    %c2_46 = arith.constant 2 : index
    %c0_47 = arith.constant 0 : index
    %c0_48 = arith.constant 0 : index
    %58 = vector.load %arg6[%c2_46, %c0_47, %c0_48] : memref<8x8x32xbf16, #tpu.memory_space<vmem>>, vector<1x8x32xbf16>
    %59 = vector.shape_cast %58 : vector<1x8x32xbf16> to vector<8x32xbf16>
    %cst_49 = arith.constant dense<0.000000e+00> : vector<2x32xf32>
    %60 = tpu.matmul %57, %59, %cst_49 {dimension_numbers = #tpu.dot_dimension_numbers<[1], [0], [0], [1], [0, 0, 1, 1], [], []>} : vector<2x8xbf16>, vector<8x32xbf16>, vector<2x32xf32> -> vector<2x32xf32>
    %61 = arith.addf %55, %60 : vector<2x32xf32>
    %c0_50 = arith.constant 0 : index
    %c3_51 = arith.constant 3 : index
    %c0_52 = arith.constant 0 : index
    %62 = vector.load %arg14[%c0_50, %c3_51, %c0_52] : memref<2x8x8xbf16, #tpu.memory_space<vmem>>, vector<2x1x8xbf16>
    %63 = vector.shape_cast %62 : vector<2x1x8xbf16> to vector<2x8xbf16>
    %c3_53 = arith.constant 3 : index
    %c0_54 = arith.constant 0 : index
    %c0_55 = arith.constant 0 : index
    %64 = vector.load %arg6[%c3_53, %c0_54, %c0_55] : memref<8x8x32xbf16, #tpu.memory_space<vmem>>, vector<1x8x32xbf16>
    %65 = vector.shape_cast %64 : vector<1x8x32xbf16> to vector<8x32xbf16>
    %cst_56 = arith.constant dense<0.000000e+00> : vector<2x32xf32>
    %66 = tpu.matmul %63, %65, %cst_56 {dimension_numbers = #tpu.dot_dimension_numbers<[1], [0], [0], [1], [0, 0, 1, 1], [], []>} : vector<2x8xbf16>, vector<8x32xbf16>, vector<2x32xf32> -> vector<2x32xf32>
    %67 = arith.addf %61, %66 : vector<2x32xf32>
    %c0_57 = arith.constant 0 : index
    %c4 = arith.constant 4 : index
    %c0_58 = arith.constant 0 : index
    %68 = vector.load %arg14[%c0_57, %c4, %c0_58] : memref<2x8x8xbf16, #tpu.memory_space<vmem>>, vector<2x1x8xbf16>
    %69 = vector.shape_cast %68 : vector<2x1x8xbf16> to vector<2x8xbf16>
    %c4_59 = arith.constant 4 : index
    %c0_60 = arith.constant 0 : index
    %c0_61 = arith.constant 0 : index
    %70 = vector.load %arg6[%c4_59, %c0_60, %c0_61] : memref<8x8x32xbf16, #tpu.memory_space<vmem>>, vector<1x8x32xbf16>
    %71 = vector.shape_cast %70 : vector<1x8x32xbf16> to vector<8x32xbf16>
    %cst_62 = arith.constant dense<0.000000e+00> : vector<2x32xf32>
    %72 = tpu.matmul %69, %71, %cst_62 {dimension_numbers = #tpu.dot_dimension_numbers<[1], [0], [0], [1], [0, 0, 1, 1], [], []>} : vector<2x8xbf16>, vector<8x32xbf16>, vector<2x32xf32> -> vector<2x32xf32>
    %73 = arith.addf %67, %72 : vector<2x32xf32>
    %c0_63 = arith.constant 0 : index
    %c5 = arith.constant 5 : index
    %c0_64 = arith.constant 0 : index
    %74 = vector.load %arg14[%c0_63, %c5, %c0_64] : memref<2x8x8xbf16, #tpu.memory_space<vmem>>, vector<2x1x8xbf16>
    %75 = vector.shape_cast %74 : vector<2x1x8xbf16> to vector<2x8xbf16>
    %c5_65 = arith.constant 5 : index
    %c0_66 = arith.constant 0 : index
    %c0_67 = arith.constant 0 : index
    %76 = vector.load %arg6[%c5_65, %c0_66, %c0_67] : memref<8x8x32xbf16, #tpu.memory_space<vmem>>, vector<1x8x32xbf16>
    %77 = vector.shape_cast %76 : vector<1x8x32xbf16> to vector<8x32xbf16>
    %cst_68 = arith.constant dense<0.000000e+00> : vector<2x32xf32>
    %78 = tpu.matmul %75, %77, %cst_68 {dimension_numbers = #tpu.dot_dimension_numbers<[1], [0], [0], [1], [0, 0, 1, 1], [], []>} : vector<2x8xbf16>, vector<8x32xbf16>, vector<2x32xf32> -> vector<2x32xf32>
    %79 = arith.addf %73, %78 : vector<2x32xf32>
    %c0_69 = arith.constant 0 : index
    %c6 = arith.constant 6 : index
    %c0_70 = arith.constant 0 : index
    %80 = vector.load %arg14[%c0_69, %c6, %c0_70] : memref<2x8x8xbf16, #tpu.memory_space<vmem>>, vector<2x1x8xbf16>
    %81 = vector.shape_cast %80 : vector<2x1x8xbf16> to vector<2x8xbf16>
    %c6_71 = arith.constant 6 : index
    %c0_72 = arith.constant 0 : index
    %c0_73 = arith.constant 0 : index
    %82 = vector.load %arg6[%c6_71, %c0_72, %c0_73] : memref<8x8x32xbf16, #tpu.memory_space<vmem>>, vector<1x8x32xbf16>
    %83 = vector.shape_cast %82 : vector<1x8x32xbf16> to vector<8x32xbf16>
    %cst_74 = arith.constant dense<0.000000e+00> : vector<2x32xf32>
    %84 = tpu.matmul %81, %83, %cst_74 {dimension_numbers = #tpu.dot_dimension_numbers<[1], [0], [0], [1], [0, 0, 1, 1], [], []>} : vector<2x8xbf16>, vector<8x32xbf16>, vector<2x32xf32> -> vector<2x32xf32>
    %85 = arith.addf %79, %84 : vector<2x32xf32>
    %c0_75 = arith.constant 0 : index
    %c7 = arith.constant 7 : index
    %c0_76 = arith.constant 0 : index
    %86 = vector.load %arg14[%c0_75, %c7, %c0_76] : memref<2x8x8xbf16, #tpu.memory_space<vmem>>, vector<2x1x8xbf16>
    %87 = vector.shape_cast %86 : vector<2x1x8xbf16> to vector<2x8xbf16>
    %c7_77 = arith.constant 7 : index
    %c0_78 = arith.constant 0 : index
    %c0_79 = arith.constant 0 : index
    %88 = vector.load %arg6[%c7_77, %c0_78, %c0_79] : memref<8x8x32xbf16, #tpu.memory_space<vmem>>, vector<1x8x32xbf16>
    %89 = vector.shape_cast %88 : vector<1x8x32xbf16> to vector<8x32xbf16>
    %cst_80 = arith.constant dense<0.000000e+00> : vector<2x32xf32>
    %90 = tpu.matmul %87, %89, %cst_80 {dimension_numbers = #tpu.dot_dimension_numbers<[1], [0], [0], [1], [0, 0, 1, 1], [], []>} : vector<2x8xbf16>, vector<8x32xbf16>, vector<2x32xf32> -> vector<2x32xf32>
    %91 = arith.addf %85, %90 : vector<2x32xf32>
    %92 = arith.truncf %91 : vector<2x32xf32> to vector<2x32xbf16>
    %c0_81 = arith.constant 0 : index
    %c0_82 = arith.constant 0 : index
    %c0_83 = arith.constant 0 : index
    %93 = vector.load %arg7[%c0_81, %c0_82, %c0_83] : memref<8x32x8xbf16, #tpu.memory_space<vmem>>, vector<1x32x8xbf16>
    %94 = vector.shape_cast %93 : vector<1x32x8xbf16> to vector<32x8xbf16>
    %cst_84 = arith.constant dense<0.000000e+00> : vector<2x8xf32>
    %95 = tpu.matmul %92, %94, %cst_84 {dimension_numbers = #tpu.dot_dimension_numbers<[1], [0], [0], [1], [0, 0, 1, 1], [], []>} : vector<2x32xbf16>, vector<32x8xbf16>, vector<2x8xf32> -> vector<2x8xf32>
    %c0_85 = arith.constant 0 : index
    %c0_86 = arith.constant 0 : index
    %96 = vector.load %arg8[%c0_85, %c0_86] : memref<8x8xf32, #tpu.memory_space<vmem>>, vector<1x8xf32>
    %97 = vector.broadcast %96 : vector<1x8xf32> to vector<2x8xf32>
    %98 = arith.addf %95, %97 : vector<2x8xf32>
    %cst_87 = arith.constant 0.000000e+00 : f32
    %99 = vector.broadcast %cst_87 : f32 to vector<2x8xf32>
    %100 = arith.maximumf %98, %99 : vector<2x8xf32>
    %101 = arith.truncf %100 : vector<2x8xf32> to vector<2x8xbf16>
    %c0_88 = arith.constant 0 : index
    %c0_89 = arith.constant 0 : index
    %c0_90 = arith.constant 0 : index
    %102 = vector.load %arg15[%c0_88, %c0_89, %c0_90] : memref<8x2x8xbf16, #tpu.memory_space<vmem>>, vector<1x2x8xbf16>
    %103 = vector.shape_cast %102 : vector<1x2x8xbf16> to vector<2x8xbf16>
    %104 = vector.shape_cast %101 : vector<2x8xbf16> to vector<1x2x8xbf16>
    tpu.vector_store %arg15[%c0_88, %c0_89, %c0_90], %104 {strides = array<i32>} : memref<8x2x8xbf16, #tpu.memory_space<vmem>>, vector<1x2x8xbf16>,
    %c1_91 = arith.constant 1 : index
    %c0_92 = arith.constant 0 : index
    %c0_93 = arith.constant 0 : index
    %105 = vector.load %arg7[%c1_91, %c0_92, %c0_93] : memref<8x32x8xbf16, #tpu.memory_space<vmem>>, vector<1x32x8xbf16>
    %106 = vector.shape_cast %105 : vector<1x32x8xbf16> to vector<32x8xbf16>
    %cst_94 = arith.constant dense<0.000000e+00> : vector<2x8xf32>
    %107 = tpu.matmul %92, %106, %cst_94 {dimension_numbers = #tpu.dot_dimension_numbers<[1], [0], [0], [1], [0, 0, 1, 1], [], []>} : vector<2x32xbf16>, vector<32x8xbf16>, vector<2x8xf32> -> vector<2x8xf32>
    %c1_95 = arith.constant 1 : index
    %c0_96 = arith.constant 0 : index
    %108 = vector.load %arg8[%c1_95, %c0_96] : memref<8x8xf32, #tpu.memory_space<vmem>>, vector<1x8xf32>
    %109 = vector.broadcast %108 : vector<1x8xf32> to vector<2x8xf32>
    %110 = arith.addf %107, %109 : vector<2x8xf32>
    %cst_97 = arith.constant 0.000000e+00 : f32
    %111 = vector.broadcast %cst_97 : f32 to vector<2x8xf32>
    %112 = arith.maximumf %110, %111 : vector<2x8xf32>
    %113 = arith.truncf %112 : vector<2x8xf32> to vector<2x8xbf16>
    %c1_98 = arith.constant 1 : index
    %c0_99 = arith.constant 0 : index
    %c0_100 = arith.constant 0 : index
    %114 = vector.load %arg15[%c1_98, %c0_99, %c0_100] : memref<8x2x8xbf16, #tpu.memory_space<vmem>>, vector<1x2x8xbf16>
    %115 = vector.shape_cast %114 : vector<1x2x8xbf16> to vector<2x8xbf16>
    %116 = vector.shape_cast %113 : vector<2x8xbf16> to vector<1x2x8xbf16>
    tpu.vector_store %arg15[%c1_98, %c0_99, %c0_100], %116 {strides = array<i32>} : memref<8x2x8xbf16, #tpu.memory_space<vmem>>, vector<1x2x8xbf16>,
    %c2_101 = arith.constant 2 : index
    %c0_102 = arith.constant 0 : index
    %c0_103 = arith.constant 0 : index
    %117 = vector.load %arg7[%c2_101, %c0_102, %c0_103] : memref<8x32x8xbf16, #tpu.memory_space<vmem>>, vector<1x32x8xbf16>
    %118 = vector.shape_cast %117 : vector<1x32x8xbf16> to vector<32x8xbf16>
    %cst_104 = arith.constant dense<0.000000e+00> : vector<2x8xf32>
    %119 = tpu.matmul %92, %118, %cst_104 {dimension_numbers = #tpu.dot_dimension_numbers<[1], [0], [0], [1], [0, 0, 1, 1], [], []>} : vector<2x32xbf16>, vector<32x8xbf16>, vector<2x8xf32> -> vector<2x8xf32>
    %c2_105 = arith.constant 2 : index
    %c0_106 = arith.constant 0 : index
    %120 = vector.load %arg8[%c2_105, %c0_106] : memref<8x8xf32, #tpu.memory_space<vmem>>, vector<1x8xf32>
    %121 = vector.broadcast %120 : vector<1x8xf32> to vector<2x8xf32>
    %122 = arith.addf %119, %121 : vector<2x8xf32>
    %cst_107 = arith.constant 0.000000e+00 : f32
    %123 = vector.broadcast %cst_107 : f32 to vector<2x8xf32>
    %124 = arith.maximumf %122, %123 : vector<2x8xf32>
    %125 = arith.truncf %124 : vector<2x8xf32> to vector<2x8xbf16>
    %c2_108 = arith.constant 2 : index
    %c0_109 = arith.constant 0 : index
    %c0_110 = arith.constant 0 : index
    %126 = vector.load %arg15[%c2_108, %c0_109, %c0_110] : memref<8x2x8xbf16, #tpu.memory_space<vmem>>, vector<1x2x8xbf16>
    %127 = vector.shape_cast %126 : vector<1x2x8xbf16> to vector<2x8xbf16>
    %128 = vector.shape_cast %125 : vector<2x8xbf16> to vector<1x2x8xbf16>
    tpu.vector_store %arg15[%c2_108, %c0_109, %c0_110], %128 {strides = array<i32>} : memref<8x2x8xbf16, #tpu.memory_space<vmem>>, vector<1x2x8xbf16>,
    %c3_111 = arith.constant 3 : index
    %c0_112 = arith.constant 0 : index
    %c0_113 = arith.constant 0 : index
    %129 = vector.load %arg7[%c3_111, %c0_112, %c0_113] : memref<8x32x8xbf16, #tpu.memory_space<vmem>>, vector<1x32x8xbf16>
    %130 = vector.shape_cast %129 : vector<1x32x8xbf16> to vector<32x8xbf16>
    %cst_114 = arith.constant dense<0.000000e+00> : vector<2x8xf32>
    %131 = tpu.matmul %92, %130, %cst_114 {dimension_numbers = #tpu.dot_dimension_numbers<[1], [0], [0], [1], [0, 0, 1, 1], [], []>} : vector<2x32xbf16>, vector<32x8xbf16>, vector<2x8xf32> -> vector<2x8xf32>
    %c3_115 = arith.constant 3 : index
    %c0_116 = arith.constant 0 : index
    %132 = vector.load %arg8[%c3_115, %c0_116] : memref<8x8xf32, #tpu.memory_space<vmem>>, vector<1x8xf32>
    %133 = vector.broadcast %132 : vector<1x8xf32> to vector<2x8xf32>
    %134 = arith.addf %131, %133 : vector<2x8xf32>
    %cst_117 = arith.constant 0.000000e+00 : f32
    %135 = vector.broadcast %cst_117 : f32 to vector<2x8xf32>
    %136 = arith.maximumf %134, %135 : vector<2x8xf32>
    %137 = arith.truncf %136 : vector<2x8xf32> to vector<2x8xbf16>
    %c3_118 = arith.constant 3 : index
    %c0_119 = arith.constant 0 : index
    %c0_120 = arith.constant 0 : index
    %138 = vector.load %arg15[%c3_118, %c0_119, %c0_120] : memref<8x2x8xbf16, #tpu.memory_space<vmem>>, vector<1x2x8xbf16>
    %139 = vector.shape_cast %138 : vector<1x2x8xbf16> to vector<2x8xbf16>
    %140 = vector.shape_cast %137 : vector<2x8xbf16> to vector<1x2x8xbf16>
    tpu.vector_store %arg15[%c3_118, %c0_119, %c0_120], %140 {strides = array<i32>} : memref<8x2x8xbf16, #tpu.memory_space<vmem>>, vector<1x2x8xbf16>,
    %c4_121 = arith.constant 4 : index
    %c0_122 = arith.constant 0 : index
    %c0_123 = arith.constant 0 : index
    %141 = vector.load %arg7[%c4_121, %c0_122, %c0_123] : memref<8x32x8xbf16, #tpu.memory_space<vmem>>, vector<1x32x8xbf16>
    %142 = vector.shape_cast %141 : vector<1x32x8xbf16> to vector<32x8xbf16>
    %cst_124 = arith.constant dense<0.000000e+00> : vector<2x8xf32>
    %143 = tpu.matmul %92, %142, %cst_124 {dimension_numbers = #tpu.dot_dimension_numbers<[1], [0], [0], [1], [0, 0, 1, 1], [], []>} : vector<2x32xbf16>, vector<32x8xbf16>, vector<2x8xf32> -> vector<2x8xf32>
    %c4_125 = arith.constant 4 : index
    %c0_126 = arith.constant 0 : index
    %144 = vector.load %arg8[%c4_125, %c0_126] : memref<8x8xf32, #tpu.memory_space<vmem>>, vector<1x8xf32>
    %145 = vector.broadcast %144 : vector<1x8xf32> to vector<2x8xf32>
    %146 = arith.addf %143, %145 : vector<2x8xf32>
    %cst_127 = arith.constant 0.000000e+00 : f32
    %147 = vector.broadcast %cst_127 : f32 to vector<2x8xf32>
    %148 = arith.maximumf %146, %147 : vector<2x8xf32>
    %149 = arith.truncf %148 : vector<2x8xf32> to vector<2x8xbf16>
    %c4_128 = arith.constant 4 : index
    %c0_129 = arith.constant 0 : index
    %c0_130 = arith.constant 0 : index
    %150 = vector.load %arg15[%c4_128, %c0_129, %c0_130] : memref<8x2x8xbf16, #tpu.memory_space<vmem>>, vector<1x2x8xbf16>
    %151 = vector.shape_cast %150 : vector<1x2x8xbf16> to vector<2x8xbf16>
    %152 = vector.shape_cast %149 : vector<2x8xbf16> to vector<1x2x8xbf16>
    tpu.vector_store %arg15[%c4_128, %c0_129, %c0_130], %152 {strides = array<i32>} : memref<8x2x8xbf16, #tpu.memory_space<vmem>>, vector<1x2x8xbf16>,
    %c5_131 = arith.constant 5 : index
    %c0_132 = arith.constant 0 : index
    %c0_133 = arith.constant 0 : index
    %153 = vector.load %arg7[%c5_131, %c0_132, %c0_133] : memref<8x32x8xbf16, #tpu.memory_space<vmem>>, vector<1x32x8xbf16>
    %154 = vector.shape_cast %153 : vector<1x32x8xbf16> to vector<32x8xbf16>
    %cst_134 = arith.constant dense<0.000000e+00> : vector<2x8xf32>
    %155 = tpu.matmul %92, %154, %cst_134 {dimension_numbers = #tpu.dot_dimension_numbers<[1], [0], [0], [1], [0, 0, 1, 1], [], []>} : vector<2x32xbf16>, vector<32x8xbf16>, vector<2x8xf32> -> vector<2x8xf32>
    %c5_135 = arith.constant 5 : index
    %c0_136 = arith.constant 0 : index
    %156 = vector.load %arg8[%c5_135, %c0_136] : memref<8x8xf32, #tpu.memory_space<vmem>>, vector<1x8xf32>
    %157 = vector.broadcast %156 : vector<1x8xf32> to vector<2x8xf32>
    %158 = arith.addf %155, %157 : vector<2x8xf32>
    %cst_137 = arith.constant 0.000000e+00 : f32
    %159 = vector.broadcast %cst_137 : f32 to vector<2x8xf32>
    %160 = arith.maximumf %158, %159 : vector<2x8xf32>
    %161 = arith.truncf %160 : vector<2x8xf32> to vector<2x8xbf16>
    %c5_138 = arith.constant 5 : index
    %c0_139 = arith.constant 0 : index
    %c0_140 = arith.constant 0 : index
    %162 = vector.load %arg15[%c5_138, %c0_139, %c0_140] : memref<8x2x8xbf16, #tpu.memory_space<vmem>>, vector<1x2x8xbf16>
    %163 = vector.shape_cast %162 : vector<1x2x8xbf16> to vector<2x8xbf16>
    %164 = vector.shape_cast %161 : vector<2x8xbf16> to vector<1x2x8xbf16>
    tpu.vector_store %arg15[%c5_138, %c0_139, %c0_140], %164 {strides = array<i32>} : memref<8x2x8xbf16, #tpu.memory_space<vmem>>, vector<1x2x8xbf16>,
    %c6_141 = arith.constant 6 : index
    %c0_142 = arith.constant 0 : index
    %c0_143 = arith.constant 0 : index
    %165 = vector.load %arg7[%c6_141, %c0_142, %c0_143] : memref<8x32x8xbf16, #tpu.memory_space<vmem>>, vector<1x32x8xbf16>
    %166 = vector.shape_cast %165 : vector<1x32x8xbf16> to vector<32x8xbf16>
    %cst_144 = arith.constant dense<0.000000e+00> : vector<2x8xf32>
    %167 = tpu.matmul %92, %166, %cst_144 {dimension_numbers = #tpu.dot_dimension_numbers<[1], [0], [0], [1], [0, 0, 1, 1], [], []>} : vector<2x32xbf16>, vector<32x8xbf16>, vector<2x8xf32> -> vector<2x8xf32>
    %c6_145 = arith.constant 6 : index
    %c0_146 = arith.constant 0 : index
    %168 = vector.load %arg8[%c6_145, %c0_146] : memref<8x8xf32, #tpu.memory_space<vmem>>, vector<1x8xf32>
    %169 = vector.broadcast %168 : vector<1x8xf32> to vector<2x8xf32>
    %170 = arith.addf %167, %169 : vector<2x8xf32>
    %cst_147 = arith.constant 0.000000e+00 : f32
    %171 = vector.broadcast %cst_147 : f32 to vector<2x8xf32>
    %172 = arith.maximumf %170, %171 : vector<2x8xf32>
    %173 = arith.truncf %172 : vector<2x8xf32> to vector<2x8xbf16>
    %c6_148 = arith.constant 6 : index
    %c0_149 = arith.constant 0 : index
    %c0_150 = arith.constant 0 : index
    %174 = vector.load %arg15[%c6_148, %c0_149, %c0_150] : memref<8x2x8xbf16, #tpu.memory_space<vmem>>, vector<1x2x8xbf16>
    %175 = vector.shape_cast %174 : vector<1x2x8xbf16> to vector<2x8xbf16>
    %176 = vector.shape_cast %173 : vector<2x8xbf16> to vector<1x2x8xbf16>
    tpu.vector_store %arg15[%c6_148, %c0_149, %c0_150], %176 {strides = array<i32>} : memref<8x2x8xbf16, #tpu.memory_space<vmem>>, vector<1x2x8xbf16>,
    %c7_151 = arith.constant 7 : index
    %c0_152 = arith.constant 0 : index
    %c0_153 = arith.constant 0 : index
    %177 = vector.load %arg7[%c7_151, %c0_152, %c0_153] : memref<8x32x8xbf16, #tpu.memory_space<vmem>>, vector<1x32x8xbf16>
    %178 = vector.shape_cast %177 : vector<1x32x8xbf16> to vector<32x8xbf16>
    %cst_154 = arith.constant dense<0.000000e+00> : vector<2x8xf32>
    %179 = tpu.matmul %92, %178, %cst_154 {dimension_numbers = #tpu.dot_dimension_numbers<[1], [0], [0], [1], [0, 0, 1, 1], [], []>} : vector<2x32xbf16>, vector<32x8xbf16>, vector<2x8xf32> -> vector<2x8xf32>
    %c7_155 = arith.constant 7 : index
    %c0_156 = arith.constant 0 : index
    %180 = vector.load %arg8[%c7_155, %c0_156] : memref<8x8xf32, #tpu.memory_space<vmem>>, vector<1x8xf32>
    %181 = vector.broadcast %180 : vector<1x8xf32> to vector<2x8xf32>
    %182 = arith.addf %179, %181 : vector<2x8xf32>
    %cst_157 = arith.constant 0.000000e+00 : f32
    %183 = vector.broadcast %cst_157 : f32 to vector<2x8xf32>
    %184 = arith.maximumf %182, %183 : vector<2x8xf32>
    %185 = arith.truncf %184 : vector<2x8xf32> to vector<2x8xbf16>
    %c7_158 = arith.constant 7 : index
    %c0_159 = arith.constant 0 : index
    %c0_160 = arith.constant 0 : index
    %186 = vector.load %arg15[%c7_158, %c0_159, %c0_160] : memref<8x2x8xbf16, #tpu.memory_space<vmem>>, vector<1x2x8xbf16>
    %187 = vector.shape_cast %186 : vector<1x2x8xbf16> to vector<2x8xbf16>
    %188 = vector.shape_cast %185 : vector<2x8xbf16> to vector<1x2x8xbf16>
    tpu.vector_store %arg15[%c7_158, %c0_159, %c0_160], %188 {strides = array<i32>} : memref<8x2x8xbf16, #tpu.memory_space<vmem>>, vector<1x2x8xbf16>,
    %c0_161 = arith.constant 0 : index
    %c0_162 = arith.constant 0 : index
    %c0_163 = arith.constant 0 : index
    %189 = vector.load %arg15[%c0_161, %c0_162, %c0_163] : memref<8x2x8xbf16, #tpu.memory_space<vmem>>, vector<8x1x8xbf16>
    %190 = vector.shape_cast %189 : vector<8x1x8xbf16> to vector<8x8xbf16>
    %c0_164 = arith.constant 0 : index
    %c0_165 = arith.constant 0 : index
    %191 = vector.load %arg16[%c0_164, %c0_165] : memref<16x8xbf16, #tpu.memory_space<vmem>>, vector<8x8xbf16>
    tpu.vector_store %arg16[%c0_164, %c0_165], %190 {strides = array<i32>} : memref<16x8xbf16, #tpu.memory_space<vmem>>, vector<8x8xbf16>,
    %c0_166 = arith.constant 0 : index
    %c1_167 = arith.constant 1 : index
    %c0_168 = arith.constant 0 : index
    %192 = vector.load %arg15[%c0_166, %c1_167, %c0_168] : memref<8x2x8xbf16, #tpu.memory_space<vmem>>, vector<8x1x8xbf16>
    %193 = vector.shape_cast %192 : vector<8x1x8xbf16> to vector<8x8xbf16>
    %c8 = arith.constant 8 : index
    %c0_169 = arith.constant 0 : index
    %194 = vector.load %arg16[%c8, %c0_169] : memref<16x8xbf16, #tpu.memory_space<vmem>>, vector<8x8xbf16>
    tpu.vector_store %arg16[%c8, %c0_169], %193 {strides = array<i32>} : memref<16x8xbf16, #tpu.memory_space<vmem>>, vector<8x8xbf16>,
    %c0_170 = arith.constant 0 : index
    %c0_171 = arith.constant 0 : index
    %195 = vector.load %arg16[%c0_170, %c0_171] : memref<16x8xbf16, #tpu.memory_space<vmem>>, vector<16x8xbf16>
    %c0_172 = arith.constant 0 : index
    %c0_173 = arith.constant 0 : index
    %196 = vector.load %arg9[%c0_172, %c0_173] : memref<8x16xbf16, #tpu.memory_space<vmem>>, vector<8x16xbf16>
    %cst_174 = arith.constant dense<0.000000e+00> : vector<16x16xf32>
    %197 = tpu.matmul %195, %196, %cst_174 {dimension_numbers = #tpu.dot_dimension_numbers<[1], [0], [0], [1], [0, 0, 1, 1], [], []>} : vector<16x8xbf16>, vector<8x16xbf16>, vector<16x16xf32> -> vector<16x16xf32>
    %198 = arith.truncf %197 : vector<16x16xf32> to vector<16x16xbf16>
    %cst_175 = arith.constant dense<0.000000e+00> : vector<16x16xf32>
    %199 = tpu.matmul %1, %198, %cst_175 {dimension_numbers = #tpu.dot_dimension_numbers<[1], [0], [0], [1], [0, 0, 1, 1], [], []>} : vector<16x16xbf16>, vector<16x16xbf16>, vector<16x16xf32> -> vector<16x16xf32>
    %c4_176 = arith.constant 4 : index
    %c0_177 = arith.constant 0 : index
    %200 = vector.load %arg12[%c4_176, %c0_177] : memref<8x128xf32, #tpu.memory_space<vmem>>, vector<1x16xf32>
    %201 = vector.broadcast %200 : vector<1x16xf32> to vector<16x16xf32>
    %202 = arith.addf %199, %201 : vector<16x16xf32>
    %cst_178 = arith.constant 0.000000e+00 : f32
    %203 = vector.broadcast %cst_178 : f32 to vector<16x16xf32>
    %204 = arith.maximumf %202, %203 : vector<16x16xf32>
    %205 = arith.truncf %204 : vector<16x16xf32> to vector<16x16xbf16>
    %c0_179 = arith.constant 0 : index
    %c0_180 = arith.constant 0 : index
    %206 = vector.load %arg10[%c0_179, %c0_180] : memref<16x16xbf16, #tpu.memory_space<vmem>>, vector<16x16xbf16>
    %cst_181 = arith.constant dense<0.000000e+00> : vector<16x16xf32>
    %207 = tpu.matmul %205, %206, %cst_181 {dimension_numbers = #tpu.dot_dimension_numbers<[1], [0], [0], [1], [0, 0, 1, 1], [], []>} : vector<16x16xbf16>, vector<16x16xbf16>, vector<16x16xf32> -> vector<16x16xf32>
    %208 = arith.truncf %207 : vector<16x16xf32> to vector<16x16xbf16>
    %cst_182 = arith.constant dense<0.000000e+00> : vector<16x16xf32>
    %209 = tpu.matmul %1, %208, %cst_182 {dimension_numbers = #tpu.dot_dimension_numbers<[1], [0], [0], [1], [0, 0, 1, 1], [], []>} : vector<16x16xbf16>, vector<16x16xbf16>, vector<16x16xf32> -> vector<16x16xf32>
    %c5_183 = arith.constant 5 : index
    %c0_184 = arith.constant 0 : index
    %210 = vector.load %arg12[%c5_183, %c0_184] : memref<8x128xf32, #tpu.memory_space<vmem>>, vector<1x16xf32>
    %211 = vector.broadcast %210 : vector<1x16xf32> to vector<16x16xf32>
    %212 = arith.addf %209, %211 : vector<16x16xf32>
    %cst_185 = arith.constant 0.000000e+00 : f32
    %213 = vector.broadcast %cst_185 : f32 to vector<16x16xf32>
    %214 = arith.maximumf %212, %213 : vector<16x16xf32>
    %215 = arith.truncf %214 : vector<16x16xf32> to vector<16x16xbf16>
    %c0_186 = arith.constant 0 : index
    %c0_187 = arith.constant 0 : index
    %216 = vector.load %arg11[%c0_186, %c0_187] : memref<16x128xbf16, #tpu.memory_space<vmem>>, vector<16x128xbf16>
    %cst_188 = arith.constant dense<0.000000e+00> : vector<16x128xf32>
    %217 = tpu.matmul %215, %216, %cst_188 {dimension_numbers = #tpu.dot_dimension_numbers<[1], [0], [0], [1], [0, 0, 1, 1], [], []>} : vector<16x16xbf16>, vector<16x128xbf16>, vector<16x128xf32> -> vector<16x128xf32>
    %218 = arith.truncf %217 : vector<16x128xf32> to vector<16x128xbf16>
    %cst_189 = arith.constant dense<0.000000e+00> : vector<16x128xf32>
    %219 = tpu.matmul %1, %218, %cst_189 {dimension_numbers = #tpu.dot_dimension_numbers<[1], [0], [0], [1], [0, 0, 1, 1], [], []>} : vector<16x16xbf16>, vector<16x128xbf16>, vector<16x128xf32> -> vector<16x128xf32>
    %c6_190 = arith.constant 6 : index
    %c0_191 = arith.constant 0 : index
    %220 = vector.load %arg12[%c6_190, %c0_191] : memref<8x128xf32, #tpu.memory_space<vmem>>, vector<1x128xf32>
    %221 = vector.broadcast %220 : vector<1x128xf32> to vector<16x128xf32>
    %222 = arith.addf %219, %221 : vector<16x128xf32>
    %c0_192 = arith.constant 0 : index
    %c0_193 = arith.constant 0 : index
    %223 = vector.load %arg13[%c0_192, %c0_193] : memref<16x128xf32, #tpu.memory_space<vmem>>, vector<16x128xf32>
    tpu.vector_store %arg13[%c0_192, %c0_193], %222 {strides = array<i32>} : memref<16x128xf32, #tpu.memory_space<vmem>>, vector<16x128xf32>,
    return
  }
  func.func @transform_0(%arg0: i32) -> (i32, i32, i32) {
    %c0_i32 = arith.constant 0 : i32
    %c0_i32_0 = arith.constant 0 : i32
    %c0_i32_1 = arith.constant 0 : i32
    return %arg0, %c0_i32, %c0_i32_0 : i32, i32, i32
  }
  func.func @transform_1(%arg0: i32) -> (i32, i32) {
    %c0_i32 = arith.constant 0 : i32
    %c0_i32_0 = arith.constant 0 : i32
    return %arg0, %c0_i32 : i32, i32
  }
  func.func @transform_2(%arg0: i32) -> (i32, i32) {
    %c0_i32 = arith.constant 0 : i32
    %c0_i32_0 = arith.constant 0 : i32
    %c0_i32_1 = arith.constant 0 : i32
    return %c0_i32, %c0_i32_0 : i32, i32
  }
  func.func @transform_3(%arg0: i32) -> (i32, i32) {
    %c0_i32 = arith.constant 0 : i32
    %c0_i32_0 = arith.constant 0 : i32
    %c0_i32_1 = arith.constant 0 : i32
    return %c0_i32, %c0_i32_0 : i32, i32
  }
  func.func @transform_4(%arg0: i32) -> (i32, i32) {
    %c0_i32 = arith.constant 0 : i32
    %c0_i32_0 = arith.constant 0 : i32
    %c0_i32_1 = arith.constant 0 : i32
    return %c0_i32, %c0_i32_0 : i32, i32
  }
  func.func @transform_5(%arg0: i32) -> (i32, i32, i32) {
    %c0_i32 = arith.constant 0 : i32
    %c0_i32_0 = arith.constant 0 : i32
    %c0_i32_1 = arith.constant 0 : i32
    %c0_i32_2 = arith.constant 0 : i32
    return %c0_i32, %c0_i32_0, %c0_i32_1 : i32, i32, i32
  }
  func.func @transform_6(%arg0: i32) -> (i32, i32, i32) {
    %c0_i32 = arith.constant 0 : i32
    %c0_i32_0 = arith.constant 0 : i32
    %c0_i32_1 = arith.constant 0 : i32
    %c0_i32_2 = arith.constant 0 : i32
    return %c0_i32, %c0_i32_0, %c0_i32_1 : i32, i32, i32
  }
  func.func @transform_7(%arg0: i32) -> (i32, i32) {
    %c0_i32 = arith.constant 0 : i32
    %c0_i32_0 = arith.constant 0 : i32
    %c0_i32_1 = arith.constant 0 : i32
    return %c0_i32, %c0_i32_0 : i32, i32
  }
  func.func @transform_8(%arg0: i32) -> (i32, i32) {
    %c0_i32 = arith.constant 0 : i32
    %c0_i32_0 = arith.constant 0 : i32
    %c0_i32_1 = arith.constant 0 : i32
    return %c0_i32, %c0_i32_0 : i32, i32
  }
  func.func @transform_9(%arg0: i32) -> (i32, i32) {
    %c0_i32 = arith.constant 0 : i32
    %c0_i32_0 = arith.constant 0 : i32
    %c0_i32_1 = arith.constant 0 : i32
    return %c0_i32, %c0_i32_0 : i32, i32
  }
  func.func @transform_10(%arg0: i32) -> (i32, i32) {
    %c0_i32 = arith.constant 0 : i32
    %c0_i32_0 = arith.constant 0 : i32
    %c0_i32_1 = arith.constant 0 : i32
    return %c0_i32, %c0_i32_0 : i32, i32
  }
  func.func @transform_11(%arg0: i32) -> (i32, i32) {
    %c0_i32 = arith.constant 0 : i32
    %c0_i32_0 = arith.constant 0 : i32
    %c0_i32_1 = arith.constant 0 : i32
    return %c0_i32, %c0_i32_0 : i32, i32
  }
  func.func @transform_12(%arg0: i32) -> (i32, i32) {
    %c0_i32 = arith.constant 0 : i32
    %c0_i32_0 = arith.constant 0 : i32
    return %arg0, %c0_i32 : i32, i32
  }
}

</mosaic_0001>

<bundles_post_ra>
// kernel: tpu_custom_call.1
= control target key start
LH: loop header
LB: loop body
LE: loop exit
PB: predicated region body
PF: predicated region fallthrough
CT: control target
= control target key end

     0   :  { %s2181_s0 = inlined_call_operand.vmem [shape: bf16[2,16,16], index: 0, kind: input, shape index: {}]   ;;  %s2182_s1 = inlined_call_operand.vmem [shape: bf16[32,4], index: 1, kind: input, shape index: {}]   ;;  %s2183_s2 = inlined_call_operand.vmem [shape: bf16[4,16], index: 2, kind: input, shape index: {}]   ;;  %s2184_s3 = inlined_call_operand.vmem [shape: bf16[16,16], index: 3, kind: input, shape index: {}]   ;;  %s2185_s4 = inlined_call_operand.vmem [shape: bf16[16,8], index: 4, kind: input, shape index: {}]   ;;  %s2186_s5 = inlined_call_operand.vmem [shape: bf16[8,8,32], index: 5, kind: input, shape index: {}]   ;;  %s2187_s6 = inlined_call_operand.vmem [shape: bf16[8,32,8], index: 6, kind: input, shape index: {}]   ;;  %s2188_s7 = inlined_call_operand.vmem [shape: f32[8,8], index: 7, kind: input, shape index: {}]   ;;  %s2189_s8 = inlined_call_operand.vmem [shape: bf16[8,16], index: 8, kind: input, shape index: {}]   ;;  %s2190_s9 = inlined_call_operand.vmem [shape: bf16[16,16], index: 9, kind: input, shape index: {}]   ;;  %s2191_s10 = inlined_call_operand.vmem [shape: bf16[16,128], index: 10, kind: input, shape index: {}]   ;;  %s2192_s11 = inlined_call_operand.vmem [shape: f32[8,128], index: 11, kind: input, shape index: {}]   ;;  %s2193_s12 = inlined_call_operand.hbm [shape: f32[32,128], index: 12, kind: output, shape index: {}]  }
   0x1   :  { %2194 = sst [smem:[#allocation8_spill]] %s2181_s0 }
   0x2   :  { %2195 = sst [smem:[#allocation9_spill]] %s2182_s1 }
   0x3   :  { %2196 = sst [smem:[#allocation10_spill]] %s2183_s2 }
   0x4   :  { %17 = vsyncpa [#allocation6], 0 }
   0x5   :  { %19 = vsyncpa [#allocation6 + $0x1], 0  ;;  %s1887_s21 = smov 0   ;;  %s1889_s22 = smov 0  }
   0x6   :  { %s1891_s23 = smov 0   ;;  %s1893_s24 = smov 0  }
   0x7 LB: > { %s1908_s25 = sadd.s32 4294967295, %s1818_s24   ;;  %s1498_s26 = sadd.s32 4294967294, %s1818_s24   ;;  %s1818_s24 = sphi %s1893_s24, %s2205_s24   ;;  %s1814_s23 = sphi %s1891_s23, %s2204_s23   ;;  %s1810_s22 = sphi %s1889_s22, %s2203_s22   ;;  %s1806_s21 = sphi %s1887_s21, %s2202_s21  }
   0x8   : > { %s1912_s27 = sadd.s32 1, %s1818_s24   ;;  %s294_s28 = sadd.s32 1, %s1814_s23 }
   0x9   : > { %s291_s29 = ssub.s32 %s1818_s24, %s1912_s27  ;;  %p304_p0 = scmp.ne.s32.totalorder %s1814_s23, %s1810_s22 }
   0xa   : > { %p292_p1 = scmp.eq.s32.totalorder %s291_s29, 0  ;;  %p305_p2 = scmp.eq.s32.totalorder %s1908_s25, 1 }
   0xb   : > { %p310_p3 = scmp.ne.s32.totalorder %s1810_s22, %s1806_s21  ;;  %p311_p4 = scmp.eq.s32.totalorder %s1498_s26, 1 }
   0xc   : > { %s1923_s30 = scalar_select %p292_p1, %s1814_s23, %s294_s28  }
   0xd   : > { %p1925_p5 = por %p305_p2, %p304_p0  ;;  %p1929_p6 = por %p311_p4, %p310_p3 }
   0xe   : > { %p1501_p7 = scmp.ge.s32.totalorder %s1818_s24, 1  ;;  %p376_p8 = scmp.lt.s32.totalorder %s1818_s24, 3 }
  0x10   : > { %p377_p9 = pnand %p1501_p7, %p376_p8 }
  0x11   : > { %s2199_s2 = sld [smem:[#allocation10_spill]] (!%p377_p9)  ;;  %s1505_s17 = sshll.u32 (!%p377_p9), %s1908_s25, 1 }
  0x12   : > { %380 = sbr.rel (%p377_p9) target bundleno = 2139 (0x85b), region = 68  ;;  %p429_p10 = scmp.lt.s32.totalorder (!%p377_p9), %s1505_s17, 3 }
  0x13   : > { %s2200_s1 = sld [smem:[#allocation9_spill]] (!%p377_p9)  ;;  %p423_p11 = scmp.lt.s32.totalorder (!%p377_p9), %s1908_s25, 1 }
  0x14   : > { %s2201_s0 = sld [smem:[#allocation8_spill]] (!%p377_p9)  ;;  %s1776_s19 = scalar_lea.hbm (!%p377_p9), %s2193_s12, 32 }
  0x17   : > { %v440_v0 = vld [vmem:[%s2199_s2] sm:$0x3]  ;;  %vm450_vm0 = vcmask 1041408   ;;  %s2207_s17 = smov (!%p429_p10, %s1505_s17), 3  ;;  %vm446_vm1 = vcmask 31744   ;;  %vm476_vm2 = vcmask 130048  }
  0x18   : > { %v452_v1 = vsel %vm450_vm0, %v440_v0, 0  ;;  %s1506_s18 = sshll.u32 %s2207_s17, 2  ;;  %v1678_v7 = vld [vmem:[%s2184_s3] sm:$0xff]  ;;  %vm612_vm3 = vcmask 1043456   ;;  %v1534_v35 = vld [vmem:[%s2186_s5 + $0x8] sm:$0xf] }
  0x19   : > { %461 = vmatpush.bf16.msra.mxu0 %v452_v1  ;;  %s432_s26 = scalar_lea.vmem %s2200_s1, %s1506_s18  ;;  %515 = vmatpush.bf16.msra.mxu2 %v1678_v7  ;;  %v1741_v9 = vld [vmem:[%s2192_s11] ss:$0 sm:$0xff]  ;;  %v1742_v21 = vld [vmem:[%s2192_s11 + $0x1] ss:$0 sm:$0xff]  ;;  %v1532_v31 = vld [vmem:[%s2186_s5 + $0x4] sm:$0xf] }
  0x1a   : > { %v1677_v2 = vld [vmem:[%s432_s26] sm:$0xff]  ;;  %s424_s28 = scalar_select %p423_p11, %s1908_s25, 1  ;;  %v639_v33 = vsel %vm612_vm3, %v1532_v31, 0  ;;  %v1538_v36 = vld [vmem:[%s2186_s5 + $0xc] sm:$0xf]  ;;  %v675_v37 = vsel %vm612_vm3, %v1534_v35, 0 }
  0x1b   : > { %v1679_v19 = vld [vmem:[%s2185_s4] sm:$0xff]  ;;  %v701_v38 = vsel %vm612_vm3, %v1538_v36, 0  ;;  %v1544_v40 = vld [vmem:[%s2186_s5 + $0x14] sm:$0xf]  ;;  %v1540_v41 = vld [vmem:[%s2186_s5 + $0x10] sm:$0xf] }
  0x1c   : > { %1511 = vmatmul.msk.bf16.vlgmr.msra.gmra.mxu0 %vm446_vm1, %v1677_v2  ;;  %s1675_s29 = sshll.u32 %s424_s28, 3  ;;  %v595_v32 = vld [vmem:[%s2186_s5] sm:$0xf]  ;;  %v1546_v42 = vld [vmem:[%s2186_s5 + $0x18] sm:$0xf]  ;;  %v763_v44 = vsel %vm612_vm3, %v1544_v40, 0 }
  0x1d   : > { %s427_s2 = scalar_lea.vmem %s2201_s0, %s1675_s29  ;;  %560 = vmatpush.bf16.msrb.mxu0 %v1679_v19  ;;  %v614_v34 = vsel %vm612_vm3, %v595_v32, 0  ;;  %v1743_v39 = vld [vmem:[%s2192_s11 + $0x2] ss:$0 sm:$0xff]  ;;  %v737_v45 = vsel %vm612_vm3, %v1540_v41, 0  ;;  %v799_v46 = vsel %vm612_vm3, %v1546_v42, 0  ;;  %vm585_vm4 = vcmask 60416  }
  0x1e   : > { %v1947_v6 = vld [vmem:[%s427_s2] sm:$0xff]  ;;  %623 = vmatpush.bf16.msrb.mxu2 %v614_v34  ;;  %v1550_v47 = vld [vmem:[%s2186_s5 + $0x1c] sm:$0xf]  ;;  %vm605_vm5 = vcmask 1041409   ;;  %vm608_vm6 = vcmask 64512   ;;  %vm860_vm7 = vcmask 261120  }
  0x1f   : > { %v825_v49 = vsel %vm612_vm3, %v1550_v47, 0  ;;  %v1685_v47 = vld [vmem:[%s2187_s6 + $0x28] sm:$0xff]  ;;  %vm879_vm8 = vcmask 57344   ;;  %vm1185_vm9 = vcmask 1042434   ;;  %vm1188_vm10 = vcmask 1043459   ;;  %s420_s28 = sand.u32 1, %s1810_s22  }
  0x20   : > { %vm1191_vm11 = vcmask 1044484   ;;  %vm1194_vm12 = vcmask 1045509   ;;  %vm1197_vm13 = vcmask 1046534   ;;  %vm1200_vm14 = vcmask 1047559   ;;  %s1502_s29 = sshll.u32 %s420_s28, 4  ;;  %s1699_s17 = sshll.u32 %s1908_s25, 4 }
  0x21   : > { %684 = vmatpush.bf16.msra.mxu0 %v675_v37  ;;  %s422_s18 = scalar_lea.vmem [#allocation5], %s1502_s29  ;;  %s1420_s2 = scalar_lea.hbm %s2193_s12, %s1699_s17 }
  0x22   : > { %s1421_s26 = sshll.u32 %s422_s18, 4  ;;  %s1423_s0 = sshll.u32 %s1420_s2, 4  ;;  %s1422_s26 = int_to_ptr.vmem [resolvable:$true] %s1421_s26  ;;  %s1424_s0 = int_to_ptr.hbm [resolvable:$true] %s1423_s0 }
  0x23   : > { %s1409_s1 = scalar_lea.sflag [#allocation6], %s420_s28  ;;  %s1770_s15 = sshra.s32 %s1424_s0, 4  ;;  %s1771_s15 = int_to_ptr.hbm [resolvable:$true] %s1770_s15 }
  0x24   : > { %s1772_s16 = scalar_lea.hbm %s1771_s15, 16  ;;  %p1777_p1 = scmp.lt.s32.totalorder %s1771_s15, %s2193_s12 }
  0x25   : > { %p1773_p12 = scmp.ne.s32.totalorder %s1771_s15, %s1772_s16  ;;  %p1778_p2 = scmp.lt.s32.totalorder %s1776_s19, %s1772_s16 }
  0x27   : > { %p1774_p13 = pnand %p1773_p12, %p1925_p5  ;;  %p1779_p3 = por %p1778_p2, %p1777_p1 }
  0x29   : > { %p1775_p0 = pneg %p1774_p13 }
  0x2b   : > { %p1780_p4 = pnand %p1779_p3, %p1775_p0 }
  0x99   : > { %v463_v3 = vpop.f32.mrf.mxu0 }
  0xa1   : > { %v465_v4 = vpop.f32.mrf.mxu0 }
  0xa2   : > { %v468_v5 = vpack.c.bf16 %v465_v4, %v463_v3 }
  0xa4   : > { %487 = vmatpush.bf16.msra.mxu1 %v468_v5 }
  0xa7   : > { %1516 = vmatmul.msk.bf16.vlgmr.msra.gmra.mxu1 %vm476_vm2, %v1947_v6 }
 0x124   : > { %v489_v8 = vpop.f32.mrf.mxu1 }
 0x125   : > { %v490_v10 = vadd.f32 %v1741_v9, %v489_v8 }
 0x127   : > { %v494_v13 = vmax.f32 %v490_v10, 0.0 }
 0x12c   : > { %v491_v11 = vpop.f32.mrf.mxu1 }
 0x12d   : > { %v492_v12 = vadd.f32 %v1741_v9, %v491_v11 }
 0x12f   : > { %v495_v14 = vmax.f32 %v492_v12, 0.0 }
 0x131   : > { %v496_v15 = vpack.c.bf16 %v495_v14, %v494_v13 }
 0x133   : > { %1521 = vmatmul.msk.bf16.vlgmr.msra.gmra.mxu2 %vm476_vm2, %v496_v15 }
 0x134   : > { %746 = vmatpush.bf16.msra.mxu2 %v737_v45  ;;  %v1681_v45 = vld [vmem:[%s2187_s6 + $0x8] sm:$0xff] }
 0x1b6   : > { %v517_v16 = vpop.f32.mrf.mxu2 }
 0x1be   : > { %v519_v17 = vpop.f32.mrf.mxu2 }
 0x1bf   : > { %v522_v18 = vpack.c.bf16 %v519_v17, %v517_v16 }
 0x1c1   : > { %532 = vmatpush.bf16.msra.mxu3 %v522_v18 }
 0x1c4   : > { %1522 = vmatmul.msk.bf16.vlgmr.msra.gmra.mxu3 %vm476_vm2, %v1947_v6 }
 0x1c5   : > { %648 = vmatpush.bf16.msrb.mxu3 %v639_v33 }
 0x1c9   : > { %772 = vmatpush.bf16.msra.mxu3 %v763_v44 }
 0x247   : > { %v534_v20 = vpop.f32.mrf.mxu3 }
 0x248   : > { %v535_v22 = vadd.f32 %v1742_v21, %v534_v20 }
 0x24a   : > { %v539_v25 = vmax.f32 %v535_v22, 0.0 }
 0x24f   : > { %v536_v23 = vpop.f32.mrf.mxu3 }
 0x250   : > { %v537_v24 = vadd.f32 %v1742_v21, %v536_v23 }
 0x252   : > { %v540_v26 = vmax.f32 %v537_v24, 0.0 }
 0x254   : > { %v541_v27 = vpack.c.bf16 %v540_v26, %v539_v25 }
 0x256   : > { %1527 = vmatmul.msk.bf16.vlgmr.msrb.gmra.mxu0 %vm476_vm2, %v541_v27 }
 0x257   : > { %808 = vmatpush.bf16.msrb.mxu0 %v799_v46  ;;  %v1683_v46 = vld [vmem:[%s2187_s6 + $0x18] sm:$0xff] }
 0x2d3   : > { %v562_v28 = vpop.f32.mrf.mxu0 }
 0x2db   : > { %v564_v29 = vpop.f32.mrf.mxu0 }
 0x2dc   : > { %v567_v30 = vpack.c.bf16 %v564_v29, %v562_v28 }
 0x2de   : > { %577 = vmatpush.bf16.msrb.mxu1 %v567_v30 }
 0x2e1   : > { %1528 = vmatmul.msk.bf16.vlgmr.msrb.gmra.mxu1 %vm476_vm2, %v1947_v6 }
 0x2e2   : > { %710 = vmatpush.bf16.msra.mxu1 %v701_v38 }
 0x2e6   : > { %834 = vmatpush.bf16.msrb.mxu1 %v825_v49  ;;  %v1680_v49 = vld [vmem:[%s2187_s6] sm:$0xff] }
 0x35e   : > { %v579_v43 = vpop.f32.mrf.mxu1 }
 0x35f   : > { %v580_v48 = vadd.f32 %v1743_v39, %v579_v43 }
 0x361   : > { %v584_v50 = vpack.c.bf16 %v580_v48, %v580_v48  ;;  %v1687_v48 = vld [vmem:[%s2187_s6 + $0x38] sm:$0xff] }
 0x363   : > { %586 = vst.msk [vmem:[#allocation2] sm:$0xf] %vm585_vm4, %v584_v50  ;;  %v1682_v50 = vld [vmem:[%s2187_s6 + $0x10] sm:$0xff] }
 0x366   : > { %v581_v51 = vpop.f32.mrf.mxu1 }
 0x367   : > { %v582_v52 = vadd.f32 %v1743_v39, %v581_v51  ;;  %v1684_v51 = vld [vmem:[%s2187_s6 + $0x20] sm:$0xff] }
 0x369   : > { %v587_v53 = vpack.c.bf16 %v582_v52, %v582_v52  ;;  %v1686_v52 = vld [vmem:[%s2187_s6 + $0x30] sm:$0xff] }
 0x36a   : > { %v593_v54 = vld [vmem:[#allocation2] sm:$0x1]  ;;  %v655_v55 = vld [vmem:[#allocation2] sm:$0x2]  ;;  %v717_v12 = vld [vmem:[#allocation2] sm:$0x4] }
 0x36b   : > { %589 = vst.msk [vmem:[#allocation2 + $0x4] sm:$0xf] %vm585_vm4, %v587_v53  ;;  %v598_v56 = vunpack.c.l.b16 %v593_v54  ;;  %v661_v57 = vunpack.c.l.b16 %v655_v55  ;;  %v779_v21 = vld [vmem:[#allocation2] sm:$0x8]  ;;  %v723_v22 = vunpack.c.l.b16 %v717_v12 }
 0x36c   : > { %v785_v25 = vunpack.c.l.b16 %v779_v21  ;;  %v1689_v55 = vld [vmem:[%s2187_s6 + $0x48] sm:$0xff] }
 0x36d   : > { %v1529_v58 = vunpack.i.l.s16 %v598_v56  ;;  %v1535_v61 = vunpack.i.l.s16 %v661_v57  ;;  %v1541_v26 = vunpack.i.l.s16 %v723_v22  ;;  %v1691_v56 = vld [vmem:[%s2187_s6 + $0x58] sm:$0xff]  ;;  %v1693_v57 = vld [vmem:[%s2187_s6 + $0x68] sm:$0xff] }
 0x36e   : > { %v1547_v29 = vunpack.i.l.s16 %v785_v25  ;;  %v1746_v25 = vld [vmem:[%s2188_s7 + $0x3] ss:$0 sm:$0xff] }
 0x36f   : > { %v632_v1 = vrot.slane %v1529_v58, 1  ;;  %v667_v3 = vrot.slane %v1535_v61, 2  ;;  %v693_v4 = vrot.slane %v1535_v61, 3  ;;  %v755_v30 = vrot.slane %v1541_v26, 5  ;;  %v1690_v61 = vld [vmem:[%s2187_s6 + $0x50] sm:$0xff] }
 0x370   : > { %v729_v35 = vrot.slane %v1541_v26, 4  ;;  %v791_v36 = vrot.slane %v1547_v29, 6  ;;  %v817_v37 = vrot.slane %v1547_v29, 7 }
 0x372   : > { %v594_v59 = vld [vmem:[#allocation2 + $0x4] sm:$0x1]  ;;  %v656_v60 = vld [vmem:[#allocation2 + $0x4] sm:$0x2]  ;;  %v718_v5 = vld [vmem:[#allocation2 + $0x4] sm:$0x4] }
 0x373   : > { %v599_v62 = vunpack.c.l.b16 %v594_v59  ;;  %v662_v63 = vunpack.c.l.b16 %v656_v60  ;;  %v780_v13 = vld [vmem:[#allocation2 + $0x4] sm:$0x8]  ;;  %v724_v17 = vunpack.c.l.b16 %v718_v5  ;;  %v1688_v60 = vld [vmem:[%s2187_s6 + $0x40] sm:$0xff] }
 0x374   : > { %v786_v23 = vunpack.c.l.b16 %v780_v13 }
 0x375   : > { %v1530_v0 = vunpack.i.l.s16 %v599_v62  ;;  %v1536_v2 = vunpack.i.l.s16 %v662_v63  ;;  %v1542_v24 = vunpack.i.l.s16 %v724_v17  ;;  %v1744_v62 = vld [vmem:[%s2192_s11 + $0x3] ss:$0 sm:$0xff] }
 0x376   : > { %v1548_v27 = vunpack.i.l.s16 %v786_v23  ;;  %v1692_v63 = vld [vmem:[%s2187_s6 + $0x60] sm:$0xff] }
 0x377   : > { %v633_v7 = vsel %vm605_vm5, %v1530_v0, %v632_v1  ;;  %v604_v8 = vrot.slane %v1530_v0, 7  ;;  %v668_v9 = vrot.slane %v1536_v2, 1  ;;  %v694_v10 = vrot.slane %v1536_v2, 2  ;;  %v1694_v0 = vld [vmem:[%s2187_s6 + $0x70] sm:$0xff] }
 0x378   : > { %v634_v11 = vpack.c.b16 %v633_v7, %v633_v7  ;;  %v756_v28 = vrot.slane %v1542_v24, 4  ;;  %v730_v31 = vrot.slane %v1542_v24, 3  ;;  %v792_v32 = vrot.slane %v1548_v27, 5  ;;  %v1745_v24 = vld [vmem:[%s2188_s7 + $0x2] ss:$0 sm:$0xff] }
 0x379   : > { %v606_v14 = vsel %vm605_vm5, %v604_v8, %v1529_v58  ;;  %v669_v15 = vsel %vm605_vm5, %v668_v9, %v667_v3  ;;  %v695_v16 = vsel %vm605_vm5, %v694_v10, %v693_v4  ;;  %v818_v33 = vrot.slane %v1548_v27, 6  ;;  %v1695_v58 = vld [vmem:[%s2187_s6 + $0x78] sm:$0xff] }
 0x37a   : > { %1533 = vmatmul.msk.bf16.vlgmr.msrb.gmra.mxu3 %vm608_vm6, %v634_v11  ;;  %v607_v18 = vpack.c.b16 %v606_v14, %v606_v14  ;;  %v670_v19 = vpack.c.b16 %v669_v15, %v669_v15  ;;  %v696_v20 = vpack.c.b16 %v695_v16, %v695_v16  ;;  %v757_v34 = vsel %vm605_vm5, %v756_v28, %v755_v30  ;;  %v1747_v30 = vld [vmem:[%s2188_s7] ss:$0 sm:$0xff] }
 0x37b   : > { %v731_v38 = vsel %vm605_vm5, %v730_v31, %v729_v35  ;;  %v793_v39 = vsel %vm605_vm5, %v792_v32, %v791_v36  ;;  %v758_v40 = vpack.c.b16 %v757_v34, %v757_v34  ;;  %v819_v41 = vsel %vm605_vm5, %v818_v33, %v817_v37  ;;  %906 = vmatpush.bf16.msrb.mxu3 %v1683_v46  ;;  %v1748_v31 = vld [vmem:[%s2188_s7 + $0x1] ss:$0 sm:$0xff] }
 0x37c   : > { %1531 = vmatmul.msk.bf16.vlgmr.msrb.gmra.mxu2 %vm608_vm6, %v607_v18  ;;  %1537 = vmatmul.msk.bf16.vlgmr.msra.gmra.mxu0 %vm608_vm6, %v670_v19  ;;  %v732_v42 = vpack.c.b16 %v731_v38, %v731_v38  ;;  %v794_v43 = vpack.c.b16 %v793_v39, %v793_v39  ;;  %v820_v44 = vpack.c.b16 %v819_v41, %v819_v41 }
 0x37d   : > { %1539 = vmatmul.msk.bf16.vlgmr.msra.gmra.mxu1 %vm608_vm6, %v696_v20  ;;  %870 = vmatpush.bf16.msrb.mxu2 %v1681_v45 }
 0x37e   : > { %942 = vmatpush.bf16.msra.mxu0 %v1685_v47  ;;  %978 = vmatpush.bf16.msra.mxu1 %v1687_v48  ;;  %v1749_v48 = vld [vmem:[%s2188_s7 + $0x6] ss:$0 sm:$0xff] }
 0x37f   : > { %907 = vmatpush.bf16.msrb.mxu3 %v1682_v50 }
 0x381   : > { %871 = vmatpush.bf16.msrb.mxu2 %v1680_v49  ;;  %v1750_v49 = vld [vmem:[%s2188_s7 + $0x7] ss:$0 sm:$0xff] }
 0x382   : > { %943 = vmatpush.bf16.msra.mxu0 %v1684_v51  ;;  %979 = vmatpush.bf16.msra.mxu1 %v1686_v52 }
 0x38a   : > { %1545 = vmatmul.msk.bf16.vlgmr.msra.gmra.mxu3 %vm608_vm6, %v758_v40 }
 0x38b   : > { %1050 = vmatpush.bf16.msra.mxu3 %v1691_v56 }
 0x38c   : > { %1543 = vmatmul.msk.bf16.vlgmr.msra.gmra.mxu2 %vm608_vm6, %v732_v42  ;;  %1549 = vmatmul.msk.bf16.vlgmr.msrb.gmra.mxu0 %vm608_vm6, %v794_v43 }
 0x38d   : > { %1551 = vmatmul.msk.bf16.vlgmr.msrb.gmra.mxu1 %vm608_vm6, %v820_v44  ;;  %1014 = vmatpush.bf16.msra.mxu2 %v1689_v55  ;;  %v1752_v55 = vld [vmem:[%s2188_s7 + $0x5] ss:$0 sm:$0xff] }
 0x38e   : > { %1086 = vmatpush.bf16.msrb.mxu0 %v1693_v57  ;;  %1122 = vmatpush.bf16.msrb.mxu1 %v1695_v58 }
 0x38f   : > { %1051 = vmatpush.bf16.msra.mxu3 %v1690_v61 }
 0x391   : > { %1015 = vmatpush.bf16.msra.mxu2 %v1688_v60 }
 0x392   : > { %1087 = vmatpush.bf16.msrb.mxu0 %v1692_v63  ;;  %1123 = vmatpush.bf16.msrb.mxu1 %v1694_v0 }
 0x3f9   : > { %v686_v53 = vpop.f32.mrf.mxu0 }
 0x3fa   : > { %v712_v54 = vpop.f32.mrf.mxu1 }
 0x3fd   : > { %v650_v59 = vpop.f32.mrf.mxu3 }
 0x3ff   : > { %v625_v1 = vpop.f32.mrf.mxu2 }
 0x400   : > { %v629_v3 = vadd.f32 %v1744_v62, %v625_v1 }
 0x401   : > { %v688_v2 = vpop.f32.mrf.mxu0 }
 0x402   : > { %v714_v4 = vpop.f32.mrf.mxu1  ;;  %v654_v7 = vadd.f32 %v650_v59, %v629_v3 }
 0x404   : > { %v690_v11 = vadd.f32 %v686_v53, %v654_v7 }
 0x405   : > { %v652_v5 = vpop.f32.mrf.mxu3 }
 0x406   : > { %v716_v13 = vadd.f32 %v712_v54, %v690_v11  ;;  %v1751_v54 = vld [vmem:[%s2188_s7 + $0x4] ss:$0 sm:$0xff] }
 0x407   : > { %v627_v8 = vpop.f32.mrf.mxu2 }
 0x409   : > { %v810_v9 = vpop.f32.mrf.mxu0 }
 0x40a   : > { %v836_v10 = vpop.f32.mrf.mxu1 }
 0x40d   : > { %v774_v12 = vpop.f32.mrf.mxu3 }
 0x40f   : > { %v748_v14 = vpop.f32.mrf.mxu2 }
 0x410   : > { %v752_v15 = vadd.f32 %v748_v14, %v716_v13 }
 0x411   : > { %v812_v16 = vpop.f32.mrf.mxu0 }
 0x412   : > { %v778_v17 = vadd.f32 %v774_v12, %v752_v15  ;;  %v838_v18 = vpop.f32.mrf.mxu1 }
 0x414   : > { %v814_v19 = vadd.f32 %v810_v9, %v778_v17 }
 0x415   : > { %v776_v20 = vpop.f32.mrf.mxu3 }
 0x416   : > { %v840_v21 = vadd.f32 %v836_v10, %v814_v19  ;;  %v1273_v19 = vld [vmem:[%s2189_s8] sm:$0xf] }
 0x417   : > { %v750_v22 = vpop.f32.mrf.mxu2  ;;  %v1283_v20 = vsel %vm612_vm3, %v1273_v19, 0 }
 0x418   : > { %v841_v23 = vpack.c.bf16 %v840_v21, %v840_v21 }
 0x41a   : > { %1560 = vmatmul.msk.bf16.vlgmr.msrb.gmra.mxu2 %vm860_vm7, %v841_v23  ;;  %1573 = vmatmul.msk.bf16.vlgmr.msrb.gmra.mxu3 %vm860_vm7, %v841_v23 }
 0x41b   : > { %1586 = vmatmul.msk.bf16.vlgmr.msra.gmra.mxu0 %vm860_vm7, %v841_v23  ;;  %1599 = vmatmul.msk.bf16.vlgmr.msra.gmra.mxu1 %vm860_vm7, %v841_v23 }
 0x41c   : > { %1292 = vmatpush.bf16.msrb.mxu2 %v1283_v20 }
 0x42a   : > { %1612 = vmatmul.msk.bf16.vlgmr.msra.gmra.mxu2 %vm860_vm7, %v841_v23  ;;  %1625 = vmatmul.msk.bf16.vlgmr.msra.gmra.mxu3 %vm860_vm7, %v841_v23 }
 0x42b   : > { %1638 = vmatmul.msk.bf16.vlgmr.msrb.gmra.mxu0 %vm860_vm7, %v841_v23  ;;  %1651 = vmatmul.msk.bf16.vlgmr.msrb.gmra.mxu1 %vm860_vm7, %v841_v23 }
 0x498   : > { %v945_v26 = vpop.f32.mrf.mxu0  ;;  %v981_v27 = vpop.f32.mrf.mxu1 }
 0x499   : > { %v946_v28 = vadd.f32 %v1745_v24, %v945_v26  ;;  %v982_v29 = vadd.f32 %v1746_v25, %v981_v27 }
 0x49b   : > { %v949_v32 = vmax.f32 %v946_v28, 0.0  ;;  %v985_v33 = vmax.f32 %v982_v29, 0.0 }
 0x49d   : > { %v950_v34 = vpack.c.bf16 %v949_v32, %v949_v32  ;;  %v986_v35 = vpack.c.bf16 %v985_v33, %v985_v33  ;;  %v873_v36 = vpop.f32.mrf.mxu2  ;;  %v909_v37 = vpop.f32.mrf.mxu3 }
 0x49e   : > { %v874_v38 = vadd.f32 %v1747_v30, %v873_v36  ;;  %v910_v39 = vadd.f32 %v1748_v31, %v909_v37 }
 0x49f   : > { %952 = vst.msk [vmem:[#allocation3 + $0x2] sm:$0x1] %vm879_vm8, %v950_v34 }
 0x4a0   : > { %988 = vst.msk [vmem:[#allocation3 + $0x3] sm:$0x1] %vm879_vm8, %v986_v35  ;;  %v877_v40 = vmax.f32 %v874_v38, 0.0  ;;  %v913_v41 = vmax.f32 %v910_v39, 0.0  ;;  %v947_v42 = vpop.f32.mrf.mxu0  ;;  %v983_v43 = vpop.f32.mrf.mxu1 }
 0x4a2   : > { %v878_v44 = vpack.c.bf16 %v877_v40, %v877_v40  ;;  %v914_v45 = vpack.c.bf16 %v913_v41, %v913_v41 }
 0x4a4   : > { %880 = vst.msk [vmem:[#allocation3] sm:$0x1] %vm879_vm8, %v878_v44 }
 0x4a5   : > { %916 = vst.msk [vmem:[#allocation3 + $0x1] sm:$0x1] %vm879_vm8, %v914_v45  ;;  %v875_v46 = vpop.f32.mrf.mxu2  ;;  %v911_v47 = vpop.f32.mrf.mxu3 }
 0x4a6   : > { %v1135_v8 = vld [vmem:[#allocation3 + $0x2] sm:$0x1] }
 0x4a7   : > { %v1136_v11 = vld [vmem:[#allocation3 + $0x3] sm:$0x1] }
 0x4a8   : > { %v1089_v50 = vpop.f32.mrf.mxu0  ;;  %v1125_v51 = vpop.f32.mrf.mxu1 }
 0x4a9   : > { %v1090_v52 = vadd.f32 %v1749_v48, %v1089_v50  ;;  %v1126_v53 = vadd.f32 %v1750_v49, %v1125_v51 }
 0x4ab   : > { %v1133_v56 = vld [vmem:[#allocation3] sm:$0x1]  ;;  %v1093_v57 = vmax.f32 %v1090_v52, 0.0  ;;  %v1129_v58 = vmax.f32 %v1126_v53, 0.0  ;;  %v1207_v52 = vld [vmem:[#allocation3 + $0x2] sm:$0x1] }
 0x4ac   : > { %1142 = vst [vmem:[#allocation1] ss:$4 sm:$0xff] %v1133_v56  ;;  %v1134_v59 = vld [vmem:[#allocation3 + $0x1] sm:$0x1]  ;;  %v1205_v37 = vld [vmem:[#allocation3] sm:$0x1] }
 0x4ad   : > { %1147 = vst [vmem:[#allocation1 + $0x20] ss:$4 sm:$0xff] %v1134_v59  ;;  %v1094_v60 = vpack.c.bf16 %v1093_v57, %v1093_v57  ;;  %v1130_v61 = vpack.c.bf16 %v1129_v58, %v1129_v58  ;;  %v1017_v62 = vpop.f32.mrf.mxu2  ;;  %v1053_v63 = vpop.f32.mrf.mxu3  ;;  %v1206_v38 = vld [vmem:[#allocation3 + $0x1] sm:$0x1] }
 0x4ae   : > { %v1018_v0 = vadd.f32 %v1751_v54, %v1017_v62  ;;  %v1054_v1 = vadd.f32 %v1752_v55, %v1053_v63  ;;  %v1208_v54 = vld [vmem:[#allocation3 + $0x3] sm:$0x1] }
 0x4af   : > { %1096 = vst.msk [vmem:[#allocation3 + $0x6] sm:$0x1] %vm879_vm8, %v1094_v60 }
 0x4b0   : > { %1132 = vst.msk [vmem:[#allocation3 + $0x7] sm:$0x1] %vm879_vm8, %v1130_v61  ;;  %v1021_v2 = vmax.f32 %v1018_v0, 0.0  ;;  %v1057_v3 = vmax.f32 %v1054_v1, 0.0  ;;  %v1091_v4 = vpop.f32.mrf.mxu0  ;;  %v1127_v5 = vpop.f32.mrf.mxu1 }
 0x4b2   : > { %v1022_v7 = vpack.c.bf16 %v1021_v2, %v1021_v2  ;;  %v1058_v10 = vpack.c.bf16 %v1057_v3, %v1057_v3 }
 0x4b3   : > { %v1143_v9 = vld [vmem:[#allocation1] sm:$0xf] }
 0x4b4   : > { %1151 = vst [vmem:[#allocation1] ss:$4 sm:$0xff] %v1135_v8  ;;  %v1148_v12 = vld [vmem:[#allocation1 + $0x20] sm:$0xf]  ;;  %v1174_v31 = vunpack.c.l.b16 %v1143_v9 }
 0x4b5   : > { %1155 = vst [vmem:[#allocation1 + $0x20] ss:$4 sm:$0xff] %v1136_v11  ;;  %v1019_v13 = vpop.f32.mrf.mxu2  ;;  %v1055_v14 = vpop.f32.mrf.mxu3  ;;  %v1175_v21 = vunpack.c.l.b16 %v1148_v12 }
 0x4b6   : > { %1024 = vst.msk [vmem:[#allocation3 + $0x4] sm:$0x1] %vm879_vm8, %v1022_v7  ;;  %v1139_v23 = vld [vmem:[#allocation3 + $0x6] sm:$0x1] }
 0x4b7   : > { %1060 = vst.msk [vmem:[#allocation3 + $0x5] sm:$0x1] %vm879_vm8, %v1058_v10  ;;  %v1140_v24 = vld [vmem:[#allocation3 + $0x7] sm:$0x1]  ;;  %v1182_v27 = vrot.slane %v1175_v21, 7 }
 0x4b8   : > { %v1211_v62 = vld [vmem:[#allocation3 + $0x6] sm:$0x1]  ;;  %v1212_v63 = vld [vmem:[#allocation3 + $0x7] sm:$0x1] }
 0x4b9   : > { %v1183_v33 = vsel %vm605_vm5, %v1182_v27, %v1174_v31 }
 0x4bb   : > { %v1152_v15 = vld [vmem:[#allocation1] sm:$0xf] }
 0x4bc   : > { %v1156_v16 = vld [vmem:[#allocation1 + $0x20] sm:$0xf]  ;;  %v1176_v22 = vunpack.c.l.b16 %v1152_v15 }
 0x4bd   : > { %v1137_v17 = vld [vmem:[#allocation3 + $0x4] sm:$0x1]  ;;  %v1177_v26 = vunpack.c.l.b16 %v1156_v16 }
 0x4be   : > { %1159 = vst [vmem:[#allocation1] ss:$4 sm:$0xff] %v1137_v17  ;;  %v1138_v18 = vld [vmem:[#allocation3 + $0x5] sm:$0x1]  ;;  %v1184_v30 = vrot.slane %v1176_v22, 6 }
 0x4bf   : > { %1163 = vst [vmem:[#allocation1 + $0x20] ss:$4 sm:$0xff] %v1138_v18  ;;  %v1187_v34 = vrot.slane %v1177_v26, 5  ;;  %v1209_v56 = vld [vmem:[#allocation3 + $0x4] sm:$0x1] }
 0x4c0   : > { %v1186_v35 = vsel %vm1185_vm9, %v1184_v30, %v1183_v33  ;;  %v1210_v58 = vld [vmem:[#allocation3 + $0x5] sm:$0x1]  ;;  %v1697_v30 = vld [vmem:[%s2190_s9] sm:$0xff] }
 0x4c1   : > { %v1189_v40 = vsel %vm1188_vm10, %v1187_v34, %v1186_v35  ;;  %1337 = vmatpush.bf16.msra.mxu0 %v1697_v30 }
 0x4c5   : > { %v1160_v25 = vld [vmem:[#allocation1] sm:$0xf] }
 0x4c6   : > { %1167 = vst [vmem:[#allocation1] ss:$4 sm:$0xff] %v1139_v23  ;;  %v1164_v28 = vld [vmem:[#allocation1 + $0x20] sm:$0xf]  ;;  %v1178_v29 = vunpack.c.l.b16 %v1160_v25 }
 0x4c7   : > { %1171 = vst [vmem:[#allocation1 + $0x20] ss:$4 sm:$0xff] %v1140_v24  ;;  %v1179_v32 = vunpack.c.l.b16 %v1164_v28 }
 0x4c8   : > { %v1190_v36 = vrot.slane %v1178_v29, 4 }
 0x4c9   : > { %v1193_v41 = vrot.slane %v1179_v32, 3  ;;  %v1753_v32 = vld [vmem:[%s2192_s11 + $0x4] ss:$0 sm:$0xff] }
 0x4ca   : > { %v1192_v44 = vsel %vm1191_vm11, %v1190_v36, %v1189_v40 }
 0x4cb   : > { %v1195_v47 = vsel %vm1194_vm12, %v1193_v41, %v1192_v44  ;;  %v1754_v44 = vld [vmem:[%s2192_s11 + $0x5] ss:$0 sm:$0xff] }
 0x4cd   : > { %v1168_v39 = vld [vmem:[#allocation1] sm:$0xf] }
 0x4ce   : > { %1214 = vst [vmem:[#allocation1] ss:$4 sm:$0xff] %v1205_v37  ;;  %v1172_v42 = vld [vmem:[#allocation1 + $0x20] sm:$0xf]  ;;  %v1180_v43 = vunpack.c.l.b16 %v1168_v39 }
 0x4cf   : > { %1219 = vst [vmem:[#allocation1 + $0x20] ss:$4 sm:$0xff] %v1206_v38  ;;  %v1181_v45 = vunpack.c.l.b16 %v1172_v42  ;;  %v1698_v42 = vld [vmem:[%s2191_s10] sm:$0xff] }
 0x4d0   : > { %v1196_v46 = vrot.slane %v1180_v43, 2  ;;  %1382 = vmatpush.bf16.msra.mxu2 %v1698_v42 }
 0x4d1   : > { %v1199_v48 = vrot.slane %v1181_v45, 1 }
 0x4d2   : > { %v1198_v49 = vsel %vm1197_vm13, %v1196_v46, %v1195_v47 }
 0x4d3   : > { %v1201_v50 = vsel %vm1200_vm14, %v1199_v48, %v1198_v49 }
 0x4d4   : > { %v1202_v51 = vpack.c.b16 %v1201_v50, %v1201_v50 }
 0x4d5   : > { %v1215_v53 = vld [vmem:[#allocation1] sm:$0xf] }
 0x4d6   : > { %1223 = vst [vmem:[#allocation1] ss:$4 sm:$0xff] %v1207_v52  ;;  %v1220_v55 = vld [vmem:[#allocation1 + $0x20] sm:$0xf]  ;;  %v1246_v60 = vunpack.c.l.b16 %v1215_v53 }
 0x4d7   : > { %1227 = vst [vmem:[#allocation1 + $0x20] ss:$4 sm:$0xff] %v1208_v54  ;;  %v1247_v7 = vunpack.c.l.b16 %v1220_v55  ;;  %v1755_v54 = vld [vmem:[%s2192_s11 + $0x6] ss:$0 sm:$0xff] }
 0x4d8   : > { %1204 = vst.msk [vmem:[#allocation4] sm:$0xf] %vm585_vm4, %v1202_v51  ;;  %v1254_v2 = vrot.slane %v1246_v60, 1 }
 0x4da   : > { %v1255_v9 = vsel %vm605_vm5, %v1247_v7, %v1254_v2 }
 0x4dd   : > { %v1224_v57 = vld [vmem:[#allocation1] sm:$0xf] }
 0x4de   : > { %1231 = vst [vmem:[#allocation1] ss:$4 sm:$0xff] %v1209_v56  ;;  %v1228_v59 = vld [vmem:[#allocation1 + $0x20] sm:$0xf]  ;;  %v1248_v61 = vunpack.c.l.b16 %v1224_v57 }
 0x4df   : > { %1235 = vst [vmem:[#allocation1 + $0x20] ss:$4 sm:$0xff] %v1210_v58  ;;  %v1249_v1 = vunpack.c.l.b16 %v1228_v59 }
 0x4e0   : > { %v1256_v5 = vrot.slane %v1248_v61, 7 }
 0x4e1   : > { %v1258_v10 = vrot.slane %v1249_v1, 6 }
 0x4e2   : > { %v1257_v11 = vsel %vm1185_vm9, %v1256_v5, %v1255_v9 }
 0x4e3   : > { %v1259_v14 = vsel %vm1188_vm10, %v1258_v10, %v1257_v11 }
 0x4e5   : > { %v1232_v0 = vld [vmem:[#allocation1] sm:$0xf] }
 0x4e6   : > { %v1236_v3 = vld [vmem:[#allocation1 + $0x20] sm:$0xf]  ;;  %1239 = vst [vmem:[#allocation1] ss:$4 sm:$0xff] %v1211_v62  ;;  %v1250_v4 = vunpack.c.l.b16 %v1232_v0 }
 0x4e7   : > { %1243 = vst [vmem:[#allocation1 + $0x20] ss:$4 sm:$0xff] %v1212_v63  ;;  %v1251_v8 = vunpack.c.l.b16 %v1236_v3 }
 0x4e8   : > { %v1260_v12 = vrot.slane %v1250_v4, 5 }
 0x4e9   : > { %v1262_v15 = vrot.slane %v1251_v8, 4 }
 0x4ea   : > { %v1261_v18 = vsel %vm1191_vm11, %v1260_v12, %v1259_v14 }
 0x4eb   : > { %v1263_v21 = vsel %vm1194_vm12, %v1262_v15, %v1261_v18 }
 0x4ed   : > { %v1240_v13 = vld [vmem:[#allocation1] sm:$0xf] }
 0x4ee   : > { %v1244_v16 = vld [vmem:[#allocation1 + $0x20] sm:$0xf]  ;;  %v1252_v17 = vunpack.c.l.b16 %v1240_v13 }
 0x4ef   : > { %v1253_v19 = vunpack.c.l.b16 %v1244_v16 }
 0x4f0   : > { %v1264_v20 = vrot.slane %v1252_v17, 3 }
 0x4f1   : > { %v1266_v22 = vrot.slane %v1253_v19, 2 }
 0x4f2   : > { %v1265_v23 = vsel %vm1197_vm13, %v1264_v20, %v1263_v21 }
 0x4f3   : > { %v1267_v24 = vsel %vm1200_vm14, %v1266_v22, %v1265_v23 }
 0x4f4   : > { %v1268_v25 = vpack.c.b16 %v1267_v24, %v1267_v24 }
 0x4f6   : > { %1270 = vst.msk [vmem:[#allocation4 + $0x4] sm:$0xf] %vm585_vm4, %v1268_v25 }
 0x4fd   : > { %v1696_v26 = vld [vmem:[#allocation4] sm:$0xff] }
 0x4fe   : > { %1656 = vmatmul.msk.bf16.vlgmr.msrb.gmra.mxu2 %vm608_vm6, %v1696_v26 }
 0x581   : > { %v1294_v27 = vpop.f32.mrf.mxu2 }
 0x589   : > { %v1296_v28 = vpop.f32.mrf.mxu2 }
 0x58a   : > { %v1299_v29 = vpack.c.bf16 %v1296_v28, %v1294_v27 }
 0x58c   : > { %1309 = vmatpush.bf16.msrb.mxu3 %v1299_v29 }
 0x58f   : > { %1657 = vmatmul.msk.bf16.vlgmr.msrb.gmra.mxu3 %vm476_vm2, %v1947_v6 }
 0x612   : > { %v1311_v31 = vpop.f32.mrf.mxu3 }
 0x613   : > { %v1312_v33 = vadd.f32 %v1753_v32, %v1311_v31 }
 0x615   : > { %v1316_v36 = vmax.f32 %v1312_v33, 0.0 }
 0x61a   : > { %v1313_v34 = vpop.f32.mrf.mxu3 }
 0x61b   : > { %v1314_v35 = vadd.f32 %v1753_v32, %v1313_v34 }
 0x61d   : > { %v1317_v37 = vmax.f32 %v1314_v35, 0.0 }
 0x61f   : > { %v1318_v38 = vpack.c.bf16 %v1317_v37, %v1316_v36 }
 0x621   : > { %1662 = vmatmul.msk.bf16.vlgmr.msra.gmra.mxu0 %vm476_vm2, %v1318_v38 }
 0x69e   : > { %v1339_v39 = vpop.f32.mrf.mxu0 }
 0x6a6   : > { %v1341_v40 = vpop.f32.mrf.mxu0 }
 0x6a7   : > { %v1344_v41 = vpack.c.bf16 %v1341_v40, %v1339_v39 }
 0x6a9   : > { %1354 = vmatpush.bf16.msra.mxu1 %v1344_v41 }
 0x6ac   : > { %1663 = vmatmul.msk.bf16.vlgmr.msra.gmra.mxu1 %vm476_vm2, %v1947_v6 }
 0x729   : > { %v1356_v43 = vpop.f32.mrf.mxu1 }
 0x72a   : > { %v1357_v45 = vadd.f32 %v1754_v44, %v1356_v43 }
 0x72c   : > { %v1361_v48 = vmax.f32 %v1357_v45, 0.0 }
 0x731   : > { %v1358_v46 = vpop.f32.mrf.mxu1 }
 0x732   : > { %v1359_v47 = vadd.f32 %v1754_v44, %v1358_v46 }
 0x734   : > { %v1362_v49 = vmax.f32 %v1359_v47, 0.0 }
 0x736   : > { %v1363_v50 = vpack.c.bf16 %v1362_v49, %v1361_v48 }
 0x738   : > { %1668 = vmatmul.msk.bf16.vlgmr.msra.gmra.mxu2 %vm476_vm2, %v1363_v50 }
 0x7bb   : > { %v1384_v51 = vpop.f32.mrf.mxu2 }
 0x7c3   : > { %v1386_v52 = vpop.f32.mrf.mxu2 }
 0x7c4   : > { %v1389_v53 = vpack.c.bf16 %v1386_v52, %v1384_v51 }
 0x7c6   : > { %1399 = vmatpush.bf16.msra.mxu3 %v1389_v53 }
 0x7c9   : > { %1669 = vmatmul.msk.bf16.vlgmr.msra.gmra.mxu3 %vm476_vm2, %v1947_v6 }
 0x84c   : > { %v1401_v55 = vpop.f32.mrf.mxu3 }
 0x84d   : > { %v1402_v56 = vadd.f32 %v1755_v54, %v1401_v55 }
 0x84f   : > { %1406 = vst [vmem:[%s422_s18] sm:$0xff] %v1402_v56 }
 0x854   : > { %v1403_v6 = vpop.f32.mrf.mxu3 }
 0x855   : > { %v1404_v57 = vadd.f32 %v1755_v54, %v1403_v6 }
 0x857   : > { %1407 = vst [vmem:[%s422_s18 + $0x8] sm:$0xff] %v1404_v57 }
 0x858   : > { %1783 = shalt.err (!%p1780_p4)
}
 0x859   : > { %s1820_s28 = smov 128   ;;  %s1821_s18 = smov 8  }
 0x85a   : > { %1700 = dma.vmem_to_hbm [thread:$0]  (%p1925_p5), %s1422_s26, 256, %s1424_s0, %s1409_s1, %s1820_s28, %s1820_s28, %s1821_s18  }
 0x85b PF: > { %p1706_p7 = scmp.ge.s32.totalorder %s1818_s24, 2  ;;  %s1438_s2 = sand.u32 1, %s1806_s21  }
 0x85c   : > { %s1439_s25 = scalar_lea.sflag [#allocation6], %s1438_s2 }
 0x85d   : > { %p1703_p8 = pnand %p1706_p7, %p1929_p6 }
 0x85f   : > { %p1704_p9 = pneg %p1703_p8 }
 0x861   : > { %1801 = dma.done.wait (%p1704_p9), %s1439_s25, 256  }
 0x862   : > { %1803 = vsyncadd (%p1704_p9), %s1439_s25, 4294967040  ;;  %p22_p10 = scmp.ge.s32.totalorder %s1912_s27, 4   ;;  %s2202_s21 = smov %s1810_s22 }
 0x863   : > { %s2203_s22 = smov %s1814_s23  ;;  %s2204_s23 = smov %s1923_s30 }
 0x864   : > { %s2205_s24 = smov %s1912_s27  ;;  %24 = sbr.rel (!%p22_p10) target bundleno = 7 (0x7), region = 130 }
 0x869   :  { %1445 = vsyncpa [#allocation6], 1 }
 0x86a   :  { %1447 = vsyncpa [#allocation6 + $0x1], 1 }

</bundles_post_ra>
